<compile_context>
chip_gen: v6e
topology: v6e:2x2x1
jax: 0.10.0
libtpu: 0.0.40
codegen_flags: <defaults>
</compile_context>

<pallas_src>
import jax
import jax.numpy as jnp
from jax import lax
from jax.experimental import pallas as pl
from jax.experimental.pallas import tpu as pltpu

BATCH_SIZE = 32      # hard-coded in the PyTorch module's forward()
EPS = 1e-5


def layer_dims(in_dim):
    # encoder 256->64->8, decoder 8->64->256->in_dim
    return [(in_dim, 256), (256, 64), (64, 8), (8, 64), (64, 256), (256, in_dim)]


def _make_kernel(dims):
    n_layers = len(dims)

    def kernel(x_ref, *refs):
        # refs = [w_0 .. w_5 (bf16, [din, dout])] + [gb_ref ([L, 2, P] f32)] + [out_ref]
        out_ref = refs[-1]
        gb_ref = refs[-2]
        w_refs = refs[:n_layers]

        h = x_ref[...].astype(jnp.float32)
        inv_b = jnp.float32(1.0 / BATCH_SIZE)

        for l, (_din, dout) in enumerate(dims):
            # Linear (bias omitted: cancelled exactly by BN's batch-mean subtraction)
            y = jnp.dot(h.astype(jnp.bfloat16), w_refs[l][...],
                        preferred_element_type=jnp.float32)

            # Training-mode BatchNorm1d, one-pass batch statistics (f32).
            s1 = jnp.sum(y, axis=0, keepdims=True)
            s2 = jnp.sum(y * y, axis=0, keepdims=True)
            mean = s1 * inv_b
            var = jnp.maximum(s2 * inv_b - mean * mean, 0.0)   # biased variance

            gb = gb_ref[l]                      # [2, P] f32 (static index)
            gamma = gb[0:1, 0:dout]
            beta = gb[1:2, 0:dout]

            y = gamma * (y - mean) * lax.rsqrt(var + EPS) + beta
            h = jnp.maximum(y, 0.0)             # ReLU

        out_ref[...] = h.astype(out_ref.dtype)

    return kernel


def autoencoder_forward(x_nchw, weights, gb):
    """x_nchw: [BATCH_SIZE, C, H, W] f32.  weights: 6 bf16 [din, dout] arrays.
    gb: [6, 2, P] f32 slab of (gamma, beta) rows, zero-padded to P lanes."""
    b = x_nchw.shape[0]
    assert b == BATCH_SIZE, "module hard-codes BATCH_SIZE in forward()"
    in_dim = int(x_nchw.size // b)
    dims = layer_dims(in_dim)
    x2d = x_nchw.reshape(b, in_dim)

    flops = 2 * b * sum(din * dout for din, dout in dims)
    bytes_accessed = (x2d.size * 4 + b * in_dim * 4 + gb.size * 4
                      + sum(int(w.size) * 2 for w in weights))
    transcendentals = sum(dout for _, dout in dims)   # one rsqrt lane per feature/layer

    kernel = _make_kernel(dims)
    n_in = 1 + len(weights) + 1                       # x, 6 weights, gb slab
    return pl.pallas_call(
        kernel,
        out_shape=jax.ShapeDtypeStruct((b, in_dim), jnp.float32),
        in_specs=[pl.BlockSpec(memory_space=pltpu.MemorySpace.VMEM)] * n_in,
        out_specs=pl.BlockSpec(memory_space=pltpu.MemorySpace.VMEM),
        cost_estimate=pl.CostEstimate(flops=flops,
                                      bytes_accessed=bytes_accessed,
                                      transcendentals=transcendentals),
    )(x2d, *weights, gb)


def init_params(in_dim, key):
    """PyTorch-shaped init (weights stored transposed [din, dout], bf16).

    Linear bias is intentionally NOT created: it is a mathematical no-op in
    front of training-mode BatchNorm. gamma=1, beta=0, packed into one slab.
    """
    dims = layer_dims(in_dim)
    P = max(dout for _, dout in dims)
    weights = []
    gb = jnp.zeros((len(dims), 2, P), jnp.float32)
    for l, (din, dout) in enumerate(dims):
        key, kw = jax.random.split(key)
        bound = 1.0 / jnp.sqrt(jnp.float32(din))
        w = jax.random.uniform(kw, (din, dout), jnp.float32, -bound, bound)
        weights.append(w.astype(jnp.bfloat16))
        gb = gb.at[l, 0, :dout].set(1.0)          # gamma = 1 ; beta row stays 0
    return weights, gb


def reference_forward(x_nchw, weights, gb):
    """Pure-JAX reference with identical semantics (bf16 matmul, f32 BN)."""
    b = x_nchw.shape[0]
    h = x_nchw.reshape(b, -1).astype(jnp.float32)
    dims = layer_dims(h.shape[1])
    for l, (_din, dout) in enumerate(dims):
        y = jnp.dot(h.astype(jnp.bfloat16), weights[l],
                    preferred_element_type=jnp.float32)
        mean = jnp.mean(y, axis=0, keepdims=True)
        var = jnp.mean((y - mean) ** 2, axis=0, keepdims=True)
        gamma = gb[l, 0:1, :dout]
        beta = gb[l, 1:2, :dout]
        y = gamma * (y - mean) * lax.rsqrt(var + EPS) + beta
        h = jnp.maximum(y, 0.0)
    return h


if __name__ == "__main__":
    key = jax.random.PRNGKey(0)
    k_x, k_p = jax.random.split(key)

    # Small NCHW input: [32, 4, 8, 8] -> flattened in_dim = 256
    C, H, W = 4, 8, 8
    in_dim = C * H * W
    x = jax.random.normal(k_x, (BATCH_SIZE, C, H, W), jnp.float32)

    weights, gb = init_params(in_dim, k_p)

    out = jax.block_until_ready(autoencoder_forward(x, weights, gb))
    ref = reference_forward(x, weights, gb)

    assert out.shape == (BATCH_SIZE, in_dim)
    assert jnp.allclose(out, ref, atol=2e-3, rtol=2e-3), "mismatch vs reference"

    print("KERNEL_OK")
</pallas_src>

<mosaic_0001>
module attributes {stable_mosaic.version = 11 : i64} {
  func.func @kernel(%arg0: memref<32x256xf32, #tpu.memory_space<vmem>>, %arg1: memref<256x256xbf16, #tpu.memory_space<vmem>>, %arg2: memref<256x64xbf16, #tpu.memory_space<vmem>>, %arg3: memref<64x8xbf16, #tpu.memory_space<vmem>>, %arg4: memref<8x64xbf16, #tpu.memory_space<vmem>>, %arg5: memref<64x256xbf16, #tpu.memory_space<vmem>>, %arg6: memref<256x256xbf16, #tpu.memory_space<vmem>>, %arg7: memref<6x2x256xf32, #tpu.memory_space<vmem>>, %arg8: memref<32x256xf32, #tpu.memory_space<vmem>>) attributes {dimension_semantics = [], scalar_prefetch = 0 : i64, scratch_operands = 0 : i64, tpu.core_type = #tpu.core_type<tc>} {
    %c0 = arith.constant 0 : index
    %c0_0 = arith.constant 0 : index
    %0 = vector.load %arg0[%c0, %c0_0] : memref<32x256xf32, #tpu.memory_space<vmem>>, vector<32x256xf32>
    %1 = arith.truncf %0 : vector<32x256xf32> to vector<32x256xbf16>
    %c0_1 = arith.constant 0 : index
    %c0_2 = arith.constant 0 : index
    %2 = vector.load %arg1[%c0_1, %c0_2] : memref<256x256xbf16, #tpu.memory_space<vmem>>, vector<256x256xbf16>
    %cst = arith.constant dense<0.000000e+00> : vector<32x256xf32>
    %3 = tpu.matmul %1, %2, %cst {dimension_numbers = #tpu.dot_dimension_numbers<[1], [0], [0], [1], [0, 0, 1, 1], [], []>} : vector<32x256xbf16>, vector<256x256xbf16>, vector<32x256xf32> -> vector<32x256xf32>
    %cst_3 = arith.constant dense<0.000000e+00> : vector<256xf32>
    %4 = vector.multi_reduction <add>, %3, %cst_3 [0] : vector<32x256xf32> to vector<256xf32>
    %5 = vector.shape_cast %4 : vector<256xf32> to vector<1x256xf32>
    %6 = arith.mulf %3, %3 : vector<32x256xf32>
    %cst_4 = arith.constant dense<0.000000e+00> : vector<256xf32>
    %7 = vector.multi_reduction <add>, %6, %cst_4 [0] : vector<32x256xf32> to vector<256xf32>
    %8 = vector.shape_cast %7 : vector<256xf32> to vector<1x256xf32>
    %cst_5 = arith.constant 3.125000e-02 : f32
    %9 = vector.broadcast %cst_5 : f32 to vector<1x256xf32>
    %10 = arith.mulf %5, %9 : vector<1x256xf32>
    %cst_6 = arith.constant 3.125000e-02 : f32
    %11 = vector.broadcast %cst_6 : f32 to vector<1x256xf32>
    %12 = arith.mulf %8, %11 : vector<1x256xf32>
    %13 = arith.mulf %10, %10 : vector<1x256xf32>
    %14 = arith.subf %12, %13 : vector<1x256xf32>
    %cst_7 = arith.constant 0.000000e+00 : f32
    %15 = vector.broadcast %cst_7 : f32 to vector<1x256xf32>
    %16 = arith.maximumf %14, %15 : vector<1x256xf32>
    %c0_8 = arith.constant 0 : index
    %c0_9 = arith.constant 0 : index
    %c0_10 = arith.constant 0 : index
    %17 = vector.load %arg7[%c0_8, %c0_9, %c0_10] : memref<6x2x256xf32, #tpu.memory_space<vmem>>, vector<1x2x256xf32>
    %18 = vector.shape_cast %17 : vector<1x2x256xf32> to vector<2x256xf32>
    %19 = vector.extract_strided_slice %18 {offsets = [0, 0], sizes = [1, 256], strides = [1, 1]} : vector<2x256xf32> to vector<1x256xf32>
    %20 = vector.extract_strided_slice %18 {offsets = [1, 0], sizes = [1, 256], strides = [1, 1]} : vector<2x256xf32> to vector<1x256xf32>
    %21 = vector.broadcast %10 : vector<1x256xf32> to vector<32x256xf32>
    %22 = arith.subf %3, %21 : vector<32x256xf32>
    %23 = vector.broadcast %19 : vector<1x256xf32> to vector<32x256xf32>
    %24 = arith.mulf %23, %22 : vector<32x256xf32>
    %cst_11 = arith.constant 9.99999974E-6 : f32
    %25 = vector.broadcast %cst_11 : f32 to vector<1x256xf32>
    %26 = arith.addf %16, %25 : vector<1x256xf32>
    %27 = math.rsqrt %26 : vector<1x256xf32>
    %28 = vector.broadcast %27 : vector<1x256xf32> to vector<32x256xf32>
    %29 = arith.mulf %24, %28 : vector<32x256xf32>
    %30 = vector.broadcast %20 : vector<1x256xf32> to vector<32x256xf32>
    %31 = arith.addf %29, %30 : vector<32x256xf32>
    %cst_12 = arith.constant 0.000000e+00 : f32
    %32 = vector.broadcast %cst_12 : f32 to vector<32x256xf32>
    %33 = arith.maximumf %31, %32 : vector<32x256xf32>
    %34 = arith.truncf %33 : vector<32x256xf32> to vector<32x256xbf16>
    %c0_13 = arith.constant 0 : index
    %c0_14 = arith.constant 0 : index
    %35 = vector.load %arg2[%c0_13, %c0_14] : memref<256x64xbf16, #tpu.memory_space<vmem>>, vector<256x64xbf16>
    %cst_15 = arith.constant dense<0.000000e+00> : vector<32x64xf32>
    %36 = tpu.matmul %34, %35, %cst_15 {dimension_numbers = #tpu.dot_dimension_numbers<[1], [0], [0], [1], [0, 0, 1, 1], [], []>} : vector<32x256xbf16>, vector<256x64xbf16>, vector<32x64xf32> -> vector<32x64xf32>
    %cst_16 = arith.constant dense<0.000000e+00> : vector<64xf32>
    %37 = vector.multi_reduction <add>, %36, %cst_16 [0] : vector<32x64xf32> to vector<64xf32>
    %38 = vector.shape_cast %37 : vector<64xf32> to vector<1x64xf32>
    %39 = arith.mulf %36, %36 : vector<32x64xf32>
    %cst_17 = arith.constant dense<0.000000e+00> : vector<64xf32>
    %40 = vector.multi_reduction <add>, %39, %cst_17 [0] : vector<32x64xf32> to vector<64xf32>
    %41 = vector.shape_cast %40 : vector<64xf32> to vector<1x64xf32>
    %cst_18 = arith.constant 3.125000e-02 : f32
    %42 = vector.broadcast %cst_18 : f32 to vector<1x64xf32>
    %43 = arith.mulf %38, %42 : vector<1x64xf32>
    %cst_19 = arith.constant 3.125000e-02 : f32
    %44 = vector.broadcast %cst_19 : f32 to vector<1x64xf32>
    %45 = arith.mulf %41, %44 : vector<1x64xf32>
    %46 = arith.mulf %43, %43 : vector<1x64xf32>
    %47 = arith.subf %45, %46 : vector<1x64xf32>
    %cst_20 = arith.constant 0.000000e+00 : f32
    %48 = vector.broadcast %cst_20 : f32 to vector<1x64xf32>
    %49 = arith.maximumf %47, %48 : vector<1x64xf32>
    %c1 = arith.constant 1 : index
    %c0_21 = arith.constant 0 : index
    %c0_22 = arith.constant 0 : index
    %50 = vector.load %arg7[%c1, %c0_21, %c0_22] : memref<6x2x256xf32, #tpu.memory_space<vmem>>, vector<1x2x256xf32>
    %51 = vector.shape_cast %50 : vector<1x2x256xf32> to vector<2x256xf32>
    %52 = vector.extract_strided_slice %51 {offsets = [0, 0], sizes = [1, 64], strides = [1, 1]} : vector<2x256xf32> to vector<1x64xf32>
    %53 = vector.extract_strided_slice %51 {offsets = [1, 0], sizes = [1, 64], strides = [1, 1]} : vector<2x256xf32> to vector<1x64xf32>
    %54 = vector.broadcast %43 : vector<1x64xf32> to vector<32x64xf32>
    %55 = arith.subf %36, %54 : vector<32x64xf32>
    %56 = vector.broadcast %52 : vector<1x64xf32> to vector<32x64xf32>
    %57 = arith.mulf %56, %55 : vector<32x64xf32>
    %cst_23 = arith.constant 9.99999974E-6 : f32
    %58 = vector.broadcast %cst_23 : f32 to vector<1x64xf32>
    %59 = arith.addf %49, %58 : vector<1x64xf32>
    %60 = math.rsqrt %59 : vector<1x64xf32>
    %61 = vector.broadcast %60 : vector<1x64xf32> to vector<32x64xf32>
    %62 = arith.mulf %57, %61 : vector<32x64xf32>
    %63 = vector.broadcast %53 : vector<1x64xf32> to vector<32x64xf32>
    %64 = arith.addf %62, %63 : vector<32x64xf32>
    %cst_24 = arith.constant 0.000000e+00 : f32
    %65 = vector.broadcast %cst_24 : f32 to vector<32x64xf32>
    %66 = arith.maximumf %64, %65 : vector<32x64xf32>
    %67 = arith.truncf %66 : vector<32x64xf32> to vector<32x64xbf16>
    %c0_25 = arith.constant 0 : index
    %c0_26 = arith.constant 0 : index
    %68 = vector.load %arg3[%c0_25, %c0_26] : memref<64x8xbf16, #tpu.memory_space<vmem>>, vector<64x8xbf16>
    %cst_27 = arith.constant dense<0.000000e+00> : vector<32x8xf32>
    %69 = tpu.matmul %67, %68, %cst_27 {dimension_numbers = #tpu.dot_dimension_numbers<[1], [0], [0], [1], [0, 0, 1, 1], [], []>} : vector<32x64xbf16>, vector<64x8xbf16>, vector<32x8xf32> -> vector<32x8xf32>
    %cst_28 = arith.constant dense<0.000000e+00> : vector<8xf32>
    %70 = vector.multi_reduction <add>, %69, %cst_28 [0] : vector<32x8xf32> to vector<8xf32>
    %71 = vector.shape_cast %70 : vector<8xf32> to vector<1x8xf32>
    %72 = arith.mulf %69, %69 : vector<32x8xf32>
    %cst_29 = arith.constant dense<0.000000e+00> : vector<8xf32>
    %73 = vector.multi_reduction <add>, %72, %cst_29 [0] : vector<32x8xf32> to vector<8xf32>
    %74 = vector.shape_cast %73 : vector<8xf32> to vector<1x8xf32>
    %cst_30 = arith.constant 3.125000e-02 : f32
    %75 = vector.broadcast %cst_30 : f32 to vector<1x8xf32>
    %76 = arith.mulf %71, %75 : vector<1x8xf32>
    %cst_31 = arith.constant 3.125000e-02 : f32
    %77 = vector.broadcast %cst_31 : f32 to vector<1x8xf32>
    %78 = arith.mulf %74, %77 : vector<1x8xf32>
    %79 = arith.mulf %76, %76 : vector<1x8xf32>
    %80 = arith.subf %78, %79 : vector<1x8xf32>
    %cst_32 = arith.constant 0.000000e+00 : f32
    %81 = vector.broadcast %cst_32 : f32 to vector<1x8xf32>
    %82 = arith.maximumf %80, %81 : vector<1x8xf32>
    %c2 = arith.constant 2 : index
    %c0_33 = arith.constant 0 : index
    %c0_34 = arith.constant 0 : index
    %83 = vector.load %arg7[%c2, %c0_33, %c0_34] : memref<6x2x256xf32, #tpu.memory_space<vmem>>, vector<1x2x256xf32>
    %84 = vector.shape_cast %83 : vector<1x2x256xf32> to vector<2x256xf32>
    %85 = vector.extract_strided_slice %84 {offsets = [0, 0], sizes = [1, 8], strides = [1, 1]} : vector<2x256xf32> to vector<1x8xf32>
    %86 = vector.extract_strided_slice %84 {offsets = [1, 0], sizes = [1, 8], strides = [1, 1]} : vector<2x256xf32> to vector<1x8xf32>
    %87 = vector.broadcast %76 : vector<1x8xf32> to vector<32x8xf32>
    %88 = arith.subf %69, %87 : vector<32x8xf32>
    %89 = vector.broadcast %85 : vector<1x8xf32> to vector<32x8xf32>
    %90 = arith.mulf %89, %88 : vector<32x8xf32>
    %cst_35 = arith.constant 9.99999974E-6 : f32
    %91 = vector.broadcast %cst_35 : f32 to vector<1x8xf32>
    %92 = arith.addf %82, %91 : vector<1x8xf32>
    %93 = math.rsqrt %92 : vector<1x8xf32>
    %94 = vector.broadcast %93 : vector<1x8xf32> to vector<32x8xf32>
    %95 = arith.mulf %90, %94 : vector<32x8xf32>
    %96 = vector.broadcast %86 : vector<1x8xf32> to vector<32x8xf32>
    %97 = arith.addf %95, %96 : vector<32x8xf32>
    %cst_36 = arith.constant 0.000000e+00 : f32
    %98 = vector.broadcast %cst_36 : f32 to vector<32x8xf32>
    %99 = arith.maximumf %97, %98 : vector<32x8xf32>
    %100 = arith.truncf %99 : vector<32x8xf32> to vector<32x8xbf16>
    %c0_37 = arith.constant 0 : index
    %c0_38 = arith.constant 0 : index
    %101 = vector.load %arg4[%c0_37, %c0_38] : memref<8x64xbf16, #tpu.memory_space<vmem>>, vector<8x64xbf16>
    %cst_39 = arith.constant dense<0.000000e+00> : vector<32x64xf32>
    %102 = tpu.matmul %100, %101, %cst_39 {dimension_numbers = #tpu.dot_dimension_numbers<[1], [0], [0], [1], [0, 0, 1, 1], [], []>} : vector<32x8xbf16>, vector<8x64xbf16>, vector<32x64xf32> -> vector<32x64xf32>
    %cst_40 = arith.constant dense<0.000000e+00> : vector<64xf32>
    %103 = vector.multi_reduction <add>, %102, %cst_40 [0] : vector<32x64xf32> to vector<64xf32>
    %104 = vector.shape_cast %103 : vector<64xf32> to vector<1x64xf32>
    %105 = arith.mulf %102, %102 : vector<32x64xf32>
    %cst_41 = arith.constant dense<0.000000e+00> : vector<64xf32>
    %106 = vector.multi_reduction <add>, %105, %cst_41 [0] : vector<32x64xf32> to vector<64xf32>
    %107 = vector.shape_cast %106 : vector<64xf32> to vector<1x64xf32>
    %cst_42 = arith.constant 3.125000e-02 : f32
    %108 = vector.broadcast %cst_42 : f32 to vector<1x64xf32>
    %109 = arith.mulf %104, %108 : vector<1x64xf32>
    %cst_43 = arith.constant 3.125000e-02 : f32
    %110 = vector.broadcast %cst_43 : f32 to vector<1x64xf32>
    %111 = arith.mulf %107, %110 : vector<1x64xf32>
    %112 = arith.mulf %109, %109 : vector<1x64xf32>
    %113 = arith.subf %111, %112 : vector<1x64xf32>
    %cst_44 = arith.constant 0.000000e+00 : f32
    %114 = vector.broadcast %cst_44 : f32 to vector<1x64xf32>
    %115 = arith.maximumf %113, %114 : vector<1x64xf32>
    %c3 = arith.constant 3 : index
    %c0_45 = arith.constant 0 : index
    %c0_46 = arith.constant 0 : index
    %116 = vector.load %arg7[%c3, %c0_45, %c0_46] : memref<6x2x256xf32, #tpu.memory_space<vmem>>, vector<1x2x256xf32>
    %117 = vector.shape_cast %116 : vector<1x2x256xf32> to vector<2x256xf32>
    %118 = vector.extract_strided_slice %117 {offsets = [0, 0], sizes = [1, 64], strides = [1, 1]} : vector<2x256xf32> to vector<1x64xf32>
    %119 = vector.extract_strided_slice %117 {offsets = [1, 0], sizes = [1, 64], strides = [1, 1]} : vector<2x256xf32> to vector<1x64xf32>
    %120 = vector.broadcast %109 : vector<1x64xf32> to vector<32x64xf32>
    %121 = arith.subf %102, %120 : vector<32x64xf32>
    %122 = vector.broadcast %118 : vector<1x64xf32> to vector<32x64xf32>
    %123 = arith.mulf %122, %121 : vector<32x64xf32>
    %cst_47 = arith.constant 9.99999974E-6 : f32
    %124 = vector.broadcast %cst_47 : f32 to vector<1x64xf32>
    %125 = arith.addf %115, %124 : vector<1x64xf32>
    %126 = math.rsqrt %125 : vector<1x64xf32>
    %127 = vector.broadcast %126 : vector<1x64xf32> to vector<32x64xf32>
    %128 = arith.mulf %123, %127 : vector<32x64xf32>
    %129 = vector.broadcast %119 : vector<1x64xf32> to vector<32x64xf32>
    %130 = arith.addf %128, %129 : vector<32x64xf32>
    %cst_48 = arith.constant 0.000000e+00 : f32
    %131 = vector.broadcast %cst_48 : f32 to vector<32x64xf32>
    %132 = arith.maximumf %130, %131 : vector<32x64xf32>
    %133 = arith.truncf %132 : vector<32x64xf32> to vector<32x64xbf16>
    %c0_49 = arith.constant 0 : index
    %c0_50 = arith.constant 0 : index
    %134 = vector.load %arg5[%c0_49, %c0_50] : memref<64x256xbf16, #tpu.memory_space<vmem>>, vector<64x256xbf16>
    %cst_51 = arith.constant dense<0.000000e+00> : vector<32x256xf32>
    %135 = tpu.matmul %133, %134, %cst_51 {dimension_numbers = #tpu.dot_dimension_numbers<[1], [0], [0], [1], [0, 0, 1, 1], [], []>} : vector<32x64xbf16>, vector<64x256xbf16>, vector<32x256xf32> -> vector<32x256xf32>
    %cst_52 = arith.constant dense<0.000000e+00> : vector<256xf32>
    %136 = vector.multi_reduction <add>, %135, %cst_52 [0] : vector<32x256xf32> to vector<256xf32>
    %137 = vector.shape_cast %136 : vector<256xf32> to vector<1x256xf32>
    %138 = arith.mulf %135, %135 : vector<32x256xf32>
    %cst_53 = arith.constant dense<0.000000e+00> : vector<256xf32>
    %139 = vector.multi_reduction <add>, %138, %cst_53 [0] : vector<32x256xf32> to vector<256xf32>
    %140 = vector.shape_cast %139 : vector<256xf32> to vector<1x256xf32>
    %cst_54 = arith.constant 3.125000e-02 : f32
    %141 = vector.broadcast %cst_54 : f32 to vector<1x256xf32>
    %142 = arith.mulf %137, %141 : vector<1x256xf32>
    %cst_55 = arith.constant 3.125000e-02 : f32
    %143 = vector.broadcast %cst_55 : f32 to vector<1x256xf32>
    %144 = arith.mulf %140, %143 : vector<1x256xf32>
    %145 = arith.mulf %142, %142 : vector<1x256xf32>
    %146 = arith.subf %144, %145 : vector<1x256xf32>
    %cst_56 = arith.constant 0.000000e+00 : f32
    %147 = vector.broadcast %cst_56 : f32 to vector<1x256xf32>
    %148 = arith.maximumf %146, %147 : vector<1x256xf32>
    %c4 = arith.constant 4 : index
    %c0_57 = arith.constant 0 : index
    %c0_58 = arith.constant 0 : index
    %149 = vector.load %arg7[%c4, %c0_57, %c0_58] : memref<6x2x256xf32, #tpu.memory_space<vmem>>, vector<1x2x256xf32>
    %150 = vector.shape_cast %149 : vector<1x2x256xf32> to vector<2x256xf32>
    %151 = vector.extract_strided_slice %150 {offsets = [0, 0], sizes = [1, 256], strides = [1, 1]} : vector<2x256xf32> to vector<1x256xf32>
    %152 = vector.extract_strided_slice %150 {offsets = [1, 0], sizes = [1, 256], strides = [1, 1]} : vector<2x256xf32> to vector<1x256xf32>
    %153 = vector.broadcast %142 : vector<1x256xf32> to vector<32x256xf32>
    %154 = arith.subf %135, %153 : vector<32x256xf32>
    %155 = vector.broadcast %151 : vector<1x256xf32> to vector<32x256xf32>
    %156 = arith.mulf %155, %154 : vector<32x256xf32>
    %cst_59 = arith.constant 9.99999974E-6 : f32
    %157 = vector.broadcast %cst_59 : f32 to vector<1x256xf32>
    %158 = arith.addf %148, %157 : vector<1x256xf32>
    %159 = math.rsqrt %158 : vector<1x256xf32>
    %160 = vector.broadcast %159 : vector<1x256xf32> to vector<32x256xf32>
    %161 = arith.mulf %156, %160 : vector<32x256xf32>
    %162 = vector.broadcast %152 : vector<1x256xf32> to vector<32x256xf32>
    %163 = arith.addf %161, %162 : vector<32x256xf32>
    %cst_60 = arith.constant 0.000000e+00 : f32
    %164 = vector.broadcast %cst_60 : f32 to vector<32x256xf32>
    %165 = arith.maximumf %163, %164 : vector<32x256xf32>
    %166 = arith.truncf %165 : vector<32x256xf32> to vector<32x256xbf16>
    %c0_61 = arith.constant 0 : index
    %c0_62 = arith.constant 0 : index
    %167 = vector.load %arg6[%c0_61, %c0_62] : memref<256x256xbf16, #tpu.memory_space<vmem>>, vector<256x256xbf16>
    %cst_63 = arith.constant dense<0.000000e+00> : vector<32x256xf32>
    %168 = tpu.matmul %166, %167, %cst_63 {dimension_numbers = #tpu.dot_dimension_numbers<[1], [0], [0], [1], [0, 0, 1, 1], [], []>} : vector<32x256xbf16>, vector<256x256xbf16>, vector<32x256xf32> -> vector<32x256xf32>
    %cst_64 = arith.constant dense<0.000000e+00> : vector<256xf32>
    %169 = vector.multi_reduction <add>, %168, %cst_64 [0] : vector<32x256xf32> to vector<256xf32>
    %170 = vector.shape_cast %169 : vector<256xf32> to vector<1x256xf32>
    %171 = arith.mulf %168, %168 : vector<32x256xf32>
    %cst_65 = arith.constant dense<0.000000e+00> : vector<256xf32>
    %172 = vector.multi_reduction <add>, %171, %cst_65 [0] : vector<32x256xf32> to vector<256xf32>
    %173 = vector.shape_cast %172 : vector<256xf32> to vector<1x256xf32>
    %cst_66 = arith.constant 3.125000e-02 : f32
    %174 = vector.broadcast %cst_66 : f32 to vector<1x256xf32>
    %175 = arith.mulf %170, %174 : vector<1x256xf32>
    %cst_67 = arith.constant 3.125000e-02 : f32
    %176 = vector.broadcast %cst_67 : f32 to vector<1x256xf32>
    %177 = arith.mulf %173, %176 : vector<1x256xf32>
    %178 = arith.mulf %175, %175 : vector<1x256xf32>
    %179 = arith.subf %177, %178 : vector<1x256xf32>
    %cst_68 = arith.constant 0.000000e+00 : f32
    %180 = vector.broadcast %cst_68 : f32 to vector<1x256xf32>
    %181 = arith.maximumf %179, %180 : vector<1x256xf32>
    %c5 = arith.constant 5 : index
    %c0_69 = arith.constant 0 : index
    %c0_70 = arith.constant 0 : index
    %182 = vector.load %arg7[%c5, %c0_69, %c0_70] : memref<6x2x256xf32, #tpu.memory_space<vmem>>, vector<1x2x256xf32>
    %183 = vector.shape_cast %182 : vector<1x2x256xf32> to vector<2x256xf32>
    %184 = vector.extract_strided_slice %183 {offsets = [0, 0], sizes = [1, 256], strides = [1, 1]} : vector<2x256xf32> to vector<1x256xf32>
    %185 = vector.extract_strided_slice %183 {offsets = [1, 0], sizes = [1, 256], strides = [1, 1]} : vector<2x256xf32> to vector<1x256xf32>
    %186 = vector.broadcast %175 : vector<1x256xf32> to vector<32x256xf32>
    %187 = arith.subf %168, %186 : vector<32x256xf32>
    %188 = vector.broadcast %184 : vector<1x256xf32> to vector<32x256xf32>
    %189 = arith.mulf %188, %187 : vector<32x256xf32>
    %cst_71 = arith.constant 9.99999974E-6 : f32
    %190 = vector.broadcast %cst_71 : f32 to vector<1x256xf32>
    %191 = arith.addf %181, %190 : vector<1x256xf32>
    %192 = math.rsqrt %191 : vector<1x256xf32>
    %193 = vector.broadcast %192 : vector<1x256xf32> to vector<32x256xf32>
    %194 = arith.mulf %189, %193 : vector<32x256xf32>
    %195 = vector.broadcast %185 : vector<1x256xf32> to vector<32x256xf32>
    %196 = arith.addf %194, %195 : vector<32x256xf32>
    %cst_72 = arith.constant 0.000000e+00 : f32
    %197 = vector.broadcast %cst_72 : f32 to vector<32x256xf32>
    %198 = arith.maximumf %196, %197 : vector<32x256xf32>
    %c0_73 = arith.constant 0 : index
    %c0_74 = arith.constant 0 : index
    %199 = vector.load %arg8[%c0_73, %c0_74] : memref<32x256xf32, #tpu.memory_space<vmem>>, vector<32x256xf32>
    tpu.vector_store %arg8[%c0_73, %c0_74], %198 {strides = array<i32>} : memref<32x256xf32, #tpu.memory_space<vmem>>, vector<32x256xf32>,
    return
  }
}

</mosaic_0001>

<bundles_post_ra>
// kernel: tpu_custom_call.1
= control target key start
LH: loop header
LB: loop body
LE: loop exit
PB: predicated region body
PF: predicated region fallthrough
CT: control target
= control target key end

     0   :  { %13 = vsyncpa [#allocation3], 0  ;;  %s2429_s0 = inlined_call_operand.vmem [shape: f32[32,256], index: 0, kind: input, shape index: {}]   ;;  %s2430_s1 = inlined_call_operand.hbm [shape: bf16[256,256], index: 1, kind: input, shape index: {}]   ;;  %s2431_s2 = inlined_call_operand.vmem [shape: bf16[256,64], index: 2, kind: input, shape index: {}]   ;;  %s2432_s3 = inlined_call_operand.vmem [shape: bf16[64,8], index: 3, kind: input, shape index: {}]   ;;  %s2433_s4 = inlined_call_operand.vmem [shape: bf16[8,64], index: 4, kind: input, shape index: {}]   ;;  %s2434_s5 = inlined_call_operand.vmem [shape: bf16[64,256], index: 5, kind: input, shape index: {}]   ;;  %s2435_s6 = inlined_call_operand.hbm [shape: bf16[256,256], index: 6, kind: input, shape index: {}]   ;;  %s2436_s7 = inlined_call_operand.vmem [shape: f32[6,2,256], index: 7, kind: input, shape index: {}]   ;;  %s2437_s8 = inlined_call_operand.hbm [shape: f32[32,256], index: 8, kind: output, shape index: {}]  }
   0x1   :  { %14 = vsyncpa [#allocation6], 0 }
   0x2   :  { %15 = vsyncpa [#allocation4], 0  ;;  %s2024_s27 = smov [#allocation2]  }
   0x3   :  { %s23_s28 = sshll.u32 %s2024_s27, 4  ;;  %s24_s28 = int_to_ptr.vmem [resolvable:$true] %s23_s28 }
   0x4   :  { %s1966_s29 = scalar_lea.vmem %s24_s28, 4096  ;;  %p1971_p1 = scmp.lt.s32.totalorder %s24_s28, %s24_s28 }
   0x5   :  { %p1967_p0 = scmp.ne.s32.totalorder %s24_s28, %s1966_s29  ;;  %p1972_p2 = scmp.lt.s32.totalorder %s1966_s29, %s1966_s29 }
   0x7   :  { %p1973_p3 = por %p1972_p2, %p1971_p1 }
   0x9   :  { %p1974_p4 = pnand %p1973_p3, %p1967_p0 }
   0xb   :  { %1977 = shalt.err (!%p1974_p4)
}
   0xc   :  { %s2025_s30 = smov 128   ;;  %s2026_s9 = smov 8  }
   0xd   :  { %29 = dma.hbm_to_vmem [thread:$0]  %s2430_s1, 4096, %s24_s28, [#allocation3], %s2025_s30, %s2025_s30, %s2026_s9  }
   0xe   :  { %s2027_s12 = smov [#allocation5]  }
   0xf   :  { %s43_s13 = sshll.u32 %s2027_s12, 4  ;;  %s44_s13 = int_to_ptr.vmem [resolvable:$true] %s43_s13 }
  0x10   :  { %s1986_s14 = scalar_lea.vmem %s44_s13, 4096  ;;  %p1991_p6 = scmp.lt.s32.totalorder %s44_s13, %s44_s13 }
  0x11   :  { %p1987_p5 = scmp.ne.s32.totalorder %s44_s13, %s1986_s14  ;;  %p1992_p7 = scmp.lt.s32.totalorder %s1986_s14, %s1986_s14 }
  0x13   :  { %p1993_p8 = por %p1992_p7, %p1991_p6 }
  0x15   :  { %p1994_p9 = pnand %p1993_p8, %p1987_p5 }
  0x17   :  { %1997 = shalt.err (!%p1994_p9)
}
  0x18   :  { %49 = dma.hbm_to_vmem [thread:$0]  %s2435_s6, 4096, %s44_s13, [#allocation6], %s2025_s30, %s2025_s30, %s2026_s9  }
  0x19   :  { %2018 = dma.done.wait [#allocation3], 4096  }
  0x1a   :  { %2019 = vsyncadd [#allocation3], 4294963200 }
  0x1b   :  { %2020 = dma.done.wait [#allocation6], 4096  }
  0x1c   :  { %2021 = vsyncadd [#allocation6], 4294963200  ;;  %v1812_v0 = vld [vmem:[#allocation2 + $0x74] ss:$8 sps:$4 sm:$0xff]   ;;  %v1814_v1 = vld [vmem:[#allocation2 + $0x70] ss:$8 sps:$4 sm:$0xff]  }
  0x1d   :  { %263 = vmatprep.subr.bf16.mxu0 %v1812_v0  ;;  %v1815_v2 = vld [vmem:[#allocation2 + $0x64] ss:$8 sps:$4 sm:$0xff]   ;;  %v1817_v3 = vld [vmem:[#allocation2 + $0x60] ss:$8 sps:$4 sm:$0xff]   ;;  %v1818_v4 = vld [vmem:[#allocation2 + $0x54] ss:$8 sps:$4 sm:$0xff]  }
  0x1e   :  { %264 = vmatpush1.bf16.msra.mxu0 %v1814_v1  ;;  %v1820_v5 = vld [vmem:[#allocation2 + $0x50] ss:$8 sps:$4 sm:$0xff]   ;;  %v1821_v6 = vld [vmem:[#allocation2 + $0x44] ss:$8 sps:$4 sm:$0xff]   ;;  %v1823_v7 = vld [vmem:[#allocation2 + $0x40] ss:$8 sps:$4 sm:$0xff]  }
  0x1f   :  { %265 = vmatprep.subr.bf16.mxu0 %v1815_v2  ;;  %v1824_v8 = vld [vmem:[#allocation2 + $0x34] ss:$8 sps:$4 sm:$0xff]   ;;  %v1826_v9 = vld [vmem:[#allocation2 + $0x30] ss:$8 sps:$4 sm:$0xff]   ;;  %v1827_v10 = vld [vmem:[#allocation2 + $0x24] ss:$8 sps:$4 sm:$0xff]  }
  0x20   :  { %v1829_v11 = vld [vmem:[#allocation2 + $0x20] ss:$8 sps:$4 sm:$0xff]   ;;  %v1830_v12 = vld [vmem:[#allocation2 + $0x14] ss:$8 sps:$4 sm:$0xff]   ;;  %v1832_v16 = vld [vmem:[#allocation2 + $0x10] ss:$8 sps:$4 sm:$0xff]  }
  0x21   :  { %v60_v13 = vld [vmem:[%s2429_s0 + $0x8] sm:$0xff]  ;;  %v62_v14 = vld [vmem:[%s2429_s0 + $0x18] sm:$0xff]  ;;  %v59_v35 = vld [vmem:[%s2429_s0] sm:$0xff]  ;;  %vm633_vm0 = vcmask 523264   ;;  %vm867_vm1 = vcmask 1043456   ;;  %vm790_vm2 = vcmask 64512  }
  0x22   :  { %266 = vmatpush1.bf16.msra.mxu0 %v1817_v3  ;;  %v68_v15 = vpack.c.bf16 %v62_v14, %v60_v13  ;;  %v1833_v17 = vld [vmem:[#allocation2 + $0x4] ss:$8 sps:$4 sm:$0xff]   ;;  %v1835_v18 = vld [vmem:[#allocation2] ss:$8 sps:$4 sm:$0xff]   ;;  %v1836_v19 = vld [vmem:[#allocation2 + $0xf4] ss:$8 sps:$4 sm:$0xff]  }
  0x23   :  { %267 = vmatprep.subr.bf16.mxu0 %v1818_v4  ;;  %v1838_v20 = vld [vmem:[#allocation2 + $0xf0] ss:$8 sps:$4 sm:$0xff]   ;;  %v1839_v21 = vld [vmem:[#allocation2 + $0xe4] ss:$8 sps:$4 sm:$0xff]   ;;  %v1841_v22 = vld [vmem:[#allocation2 + $0xe0] ss:$8 sps:$4 sm:$0xff]  }
  0x24   :  { %295 = vmatprep.mubr.bf16.mxu0 %v68_v15  ;;  %v1842_v23 = vld [vmem:[#allocation2 + $0xd4] ss:$8 sps:$4 sm:$0xff]   ;;  %v1844_v24 = vld [vmem:[#allocation2 + $0xd0] ss:$8 sps:$4 sm:$0xff]   ;;  %v1845_v25 = vld [vmem:[#allocation2 + $0xc4] ss:$8 sps:$4 sm:$0xff]  }
  0x25   :  { %v1847_v26 = vld [vmem:[#allocation2 + $0xc0] ss:$8 sps:$4 sm:$0xff]   ;;  %v1848_v27 = vld [vmem:[#allocation2 + $0xb4] ss:$8 sps:$4 sm:$0xff]   ;;  %v1850_v28 = vld [vmem:[#allocation2 + $0xb0] ss:$8 sps:$4 sm:$0xff]  }
  0x26   :  { %268 = vmatpush1.bf16.msra.mxu0 %v1820_v5  ;;  %v1851_v29 = vld [vmem:[#allocation2 + $0xa4] ss:$8 sps:$4 sm:$0xff]   ;;  %v1853_v30 = vld [vmem:[#allocation2 + $0xa0] ss:$8 sps:$4 sm:$0xff]   ;;  %v1854_v31 = vld [vmem:[#allocation2 + $0x94] ss:$8 sps:$4 sm:$0xff]  }
  0x27   :  { %269 = vmatprep.subr.bf16.mxu0 %v1821_v6  ;;  %v1856_v32 = vld [vmem:[#allocation2 + $0x90] ss:$8 sps:$4 sm:$0xff]   ;;  %v1857_v33 = vld [vmem:[#allocation2 + $0x84] ss:$8 sps:$4 sm:$0xff]   ;;  %v1859_v34 = vld [vmem:[#allocation2 + $0x80] ss:$8 sps:$4 sm:$0xff]  }
  0x28   :  { %v61_v36 = vld [vmem:[%s2429_s0 + $0x10] sm:$0xff]  ;;  %v64_v37 = vld [vmem:[%s2429_s0 + $0x28] sm:$0xff]  ;;  %v66_v38 = vld [vmem:[%s2429_s0 + $0x38] sm:$0xff] }
  0x29   :  { %v67_v39 = vpack.c.bf16 %v61_v36, %v59_v35  ;;  %v70_v40 = vpack.c.bf16 %v66_v38, %v64_v37  ;;  %v63_v41 = vld [vmem:[%s2429_s0 + $0x20] sm:$0xff]  ;;  %v65_v42 = vld [vmem:[%s2429_s0 + $0x30] sm:$0xff]  ;;  %v1860_v44 = vld [vmem:[%s2431_s2 + $0x78] sm:$0xff]  }
  0x2a   :  { %270 = vmatpush1.bf16.msra.mxu0 %v1823_v7  ;;  %v69_v43 = vpack.c.bf16 %v65_v42, %v63_v41  ;;  %v1861_v45 = vld [vmem:[%s2431_s2 + $0x38] sm:$0xff]   ;;  %1748 = vmatprep.subr.bf16.mxu1 %v1860_v44  ;;  %v1862_v46 = vld [vmem:[%s2431_s2 + $0x70] sm:$0xff]   ;;  %v1864_v48 = vld [vmem:[%s2431_s2 + $0x68] sm:$0xff]  }
  0x2b   :  { %271 = vmatprep.subr.bf16.mxu0 %v1824_v8  ;;  %1749 = vmatpush3.bf16.msra.mxu1 %v1861_v45  ;;  %v1863_v47 = vld [vmem:[%s2431_s2 + $0x30] sm:$0xff]   ;;  %v1865_v49 = vld [vmem:[%s2431_s2 + $0x28] sm:$0xff]   ;;  %v1866_v50 = vld [vmem:[%s2431_s2 + $0x60] sm:$0xff]  }
  0x2c   :  { %1750 = vmatprep.subr.bf16.mxu1 %v1862_v46  ;;  %v1867_v51 = vld [vmem:[%s2431_s2 + $0x20] sm:$0xff]   ;;  %v1868_v52 = vld [vmem:[%s2431_s2 + $0x58] sm:$0xff]   ;;  %v1870_v54 = vld [vmem:[%s2431_s2 + $0x50] sm:$0xff]  }
  0x2d   :  { %v1869_v53 = vld [vmem:[%s2431_s2 + $0x18] sm:$0xff]   ;;  %v1871_v55 = vld [vmem:[%s2431_s2 + $0x10] sm:$0xff]   ;;  %v1872_v56 = vld [vmem:[%s2431_s2 + $0x48] sm:$0xff]  }
  0x2e   :  { %272 = vmatpush1.bf16.msra.mxu0 %v1826_v9  ;;  %v1873_v57 = vld [vmem:[%s2431_s2 + $0x8] sm:$0xff]   ;;  %v1874_v58 = vld [vmem:[%s2431_s2 + $0x40] sm:$0xff]  }
  0x2f   :  { %273 = vmatprep.subr.bf16.mxu0 %v1827_v10  ;;  %1751 = vmatpush3.bf16.msra.mxu1 %v1863_v47  ;;  %v1875_v59 = vld [vmem:[%s2431_s2] sm:$0xff]  }
  0x30   :  { %1752 = vmatprep.subr.bf16.mxu1 %v1864_v48 }
  0x32   :  { %274 = vmatpush1.bf16.msra.mxu0 %v1829_v11 }
  0x33   :  { %275 = vmatprep.subr.bf16.mxu0 %v1830_v12  ;;  %1753 = vmatpush3.bf16.msra.mxu1 %v1865_v49 }
  0x34   :  { %1754 = vmatprep.subr.bf16.mxu1 %v1866_v50  ;;  %v380_v50 = vlaneseq }
  0x36   :  { %276 = vmatpush1.bf16.msra.mxu0 %v1832_v16 }
  0x37   :  { %277 = vmatprep.subr.bf16.mxu0 %v1833_v17  ;;  %1755 = vmatpush3.bf16.msra.mxu1 %v1867_v51 }
  0x38   :  { %1756 = vmatprep.subr.bf16.mxu1 %v1868_v52 }
  0x3a   :  { %278 = vmatpush1.bf16.msra.mxu0 %v1835_v18 }
  0x3b   :  { %279 = vmatprep.subr.bf16.mxu0 %v1836_v19  ;;  %1757 = vmatpush3.bf16.msra.mxu1 %v1869_v53 }
  0x3c   :  { %1758 = vmatprep.subr.bf16.mxu1 %v1870_v54 }
  0x3e   :  { %280 = vmatpush2.bf16.msra.mxu0 %v1838_v20 }
  0x3f   :  { %281 = vmatprep.subr.bf16.mxu0 %v1839_v21  ;;  %1759 = vmatpush3.bf16.msra.mxu1 %v1871_v55 }
  0x40   :  { %1760 = vmatprep.subr.bf16.mxu1 %v1872_v56 }
  0x42   :  { %282 = vmatpush2.bf16.msra.mxu0 %v1841_v22 }
  0x43   :  { %283 = vmatprep.subr.bf16.mxu0 %v1842_v23  ;;  %1761 = vmatpush3.bf16.msra.mxu1 %v1873_v57  ;;  %v381_v57 = vshrl.u32 %v380_v50, 7 }
  0x44   :  { %1762 = vmatprep.subr.bf16.mxu1 %v1874_v58 }
  0x46   :  { %284 = vmatpush2.bf16.msra.mxu0 %v1844_v24 }
  0x47   :  { %285 = vmatprep.subr.bf16.mxu0 %v1845_v25  ;;  %1763 = vmatpush3.bf16.msra.mxu1 %v1875_v59 }
  0x4a   :  { %286 = vmatpush2.bf16.msra.mxu0 %v1847_v26 }
  0x4b   :  { %287 = vmatprep.subr.bf16.mxu0 %v1848_v27 }
  0x4e   :  { %288 = vmatpush2.bf16.msra.mxu0 %v1850_v28 }
  0x4f   :  { %289 = vmatprep.subr.bf16.mxu0 %v1851_v29 }
  0x52   :  { %290 = vmatpush2.bf16.msra.mxu0 %v1853_v30 }
  0x53   :  { %291 = vmatprep.subr.bf16.mxu0 %v1854_v31 }
  0x56   :  { %292 = vmatpush2.bf16.msra.mxu0 %v1856_v32 }
  0x57   :  { %293 = vmatprep.subr.bf16.mxu0 %v1857_v33 }
  0x5a   :  { %294 = vmatpush2.bf16.msra.mxu0 %v1859_v34 }
  0x5d   :  { %296 = vmatmul.mubr.bf16.vlgmr.msra.gmra.mxu0 %v67_v39 }
  0x5e   :  { %305 = vmatprep.mubr.bf16.mxu0 %v70_v40 }
  0x65   :  { %306 = vmatmul.mubr.bf16.gmra.mxu0 %v69_v43 }
 0x11d   :  { %v2155_v60 = vpop.f32.mrf.mxu0 }
 0x11e   :  { %v334_v3 = vmul.f32 %v2155_v60, %v2155_v60 }
 0x11f   :  { %v2157_v61 = vpop.f32.mrf.mxu0 }
 0x120   :  { %v335_v6 = vmul.f32 %v2157_v61, %v2157_v61 }
 0x121   :  { %v2159_v62 = vpop.f32.mrf.mxu0 }
 0x122   :  { %v336_v0 = vmul.f32 %v2159_v62, %v2159_v62  ;;  %v316_v4 = vadd.f32 %v2159_v62, %v2155_v60 }
 0x123   :  { %v2161_v63 = vpop.f32.mrf.mxu0 }
 0x124   :  { %v337_v1 = vmul.f32 %v2161_v63, %v2161_v63  ;;  %v342_v8 = vadd.f32 %v336_v0, %v334_v3  ;;  %v325_v9 = vadd.f32 %v2161_v63, %v2157_v61  ;;  %v370_v3 = vld [vmem:[%s2436_s7] sm:$0xf] }
 0x125   :  { %v2167_v2 = vpop.f32.mrf.mxu0 }
 0x126   :  { %v338_v5 = vmul.f32 %v2167_v2, %v2167_v2  ;;  %v317_v10 = vadd.f32 %v316_v4, %v2167_v2  ;;  %v351_v12 = vadd.f32 %v337_v1, %v335_v6  ;;  %v2195_v1 = vsub.s32 0, %v381_v57 }
 0x127   :  { %v2177_v7 = vpop.f32.mrf.mxu0 }
 0x128   :  { %v339_v11 = vmul.f32 %v2177_v7, %v2177_v7  ;;  %v343_v14 = vadd.f32 %v342_v8, %v338_v5  ;;  %v326_v15 = vadd.f32 %v325_v9, %v2177_v7  ;;  %v2200_v5 = vsub.s32 2, %v381_v57 }
 0x129   :  { %v2184_v13 = vpop.f32.mrf.mxu0  ;;  %v383_v6 = vrot.slane %v370_v3, %v2195_v1  ;;  %v2203_v8 = vsub.s32 1, %v381_v57  ;;  %v2205_v9 = vsub.s32 3, %v381_v57  ;;  %v1876_v57 = vld [vmem:[%s2432_s3 + $0x18] sm:$0xff]  }
 0x12a   :  { %v318_v16 = vadd.f32 %v317_v10, %v2184_v13  ;;  %v340_v17 = vmul.f32 %v2184_v13, %v2184_v13  ;;  %v352_v18 = vadd.f32 %v351_v12, %v339_v11  ;;  %v387_v10 = vrot.slane %v370_v3, %v2200_v5  ;;  %1785 = vmatprep.subr.bf16.mxu1 %v1876_v57 }
 0x12b   :  { %v2190_v19 = vpop.f32.mrf.mxu0  ;;  %v393_v11 = vrot.slane %v383_v6, %v2195_v1 }
 0x12c   :  { %v319_v20 = vrot.slane %v318_v16, 4  ;;  %v344_v21 = vadd.f32 %v343_v14, %v340_v17  ;;  %v327_v22 = vadd.f32 %v326_v15, %v2190_v19  ;;  %v341_v23 = vmul.f32 %v2190_v19, %v2190_v19 }
 0x12d   :  { %v421_v15 = vrot.slane %v370_v3, %v2203_v8  ;;  %v397_v17 = vrot.slane %v387_v10, %v2195_v1 }
 0x12e   :  { %v320_v24 = vadd.f32 %v319_v20, %v318_v16  ;;  %v345_v25 = vrot.slane %v344_v21, 4  ;;  %v328_v26 = vrot.slane %v327_v22, 4  ;;  %v353_v27 = vadd.f32 %v352_v18, %v341_v23 }
 0x12f   :  { %v425_v16 = vrot.slane %v370_v3, %v2205_v9 }
 0x130   :  { %v321_v28 = vrot.slane %v320_v24, 2  ;;  %v346_v29 = vadd.f32 %v345_v25, %v344_v21  ;;  %v329_v30 = vadd.f32 %v328_v26, %v327_v22  ;;  %v354_v31 = vrot.slane %v353_v27, 4 }
 0x132   :  { %v322_v32 = vadd.f32 %v321_v28, %v320_v24  ;;  %v347_v33 = vrot.slane %v346_v29, 2  ;;  %v330_v34 = vrot.slane %v329_v30, 2  ;;  %v355_v35 = vadd.f32 %v354_v31, %v353_v27 }
 0x134   :  { %v323_v36 = vrot.slane %v322_v32, 1  ;;  %v348_v37 = vadd.f32 %v347_v33, %v346_v29  ;;  %v331_v38 = vadd.f32 %v330_v34, %v329_v30  ;;  %v356_v39 = vrot.slane %v355_v35, 2 }
 0x136   :  { %v324_v40 = vadd.f32 %v323_v36, %v322_v32  ;;  %v349_v41 = vrot.slane %v348_v37, 1  ;;  %v332_v42 = vrot.slane %v331_v38, 1  ;;  %v357_v43 = vadd.f32 %v356_v39, %v355_v35 }
 0x138   :  { %v350_v44 = vadd.f32 %v349_v41, %v348_v37  ;;  %v360_v45 = vmul.f32 0.03125, %v324_v40  ;;  %v333_v46 = vadd.f32 %v332_v42, %v331_v38  ;;  %v358_v47 = vrot.slane %v357_v43, 1 }
 0x13a   :  { %v362_v48 = vmul.f32 0.03125, %v350_v44  ;;  %v364_v49 = vmul.f32 %v360_v45, %v360_v45  ;;  %v359_v51 = vadd.f32 %v358_v47, %v357_v43  ;;  %v361_v52 = vmul.f32 0.03125, %v333_v46 }
 0x13b   :  { %v371_v12 = vsub.f32 %v2155_v60, %v360_v45  ;;  %v373_v14 = vsub.f32 %v2159_v62, %v360_v45  ;;  %v431_v60 = vrot.slane %v421_v15, %v2203_v8  ;;  %v435_v62 = vrot.slane %v425_v16, %v2203_v8 }
 0x13c   :  { %v366_v53 = vsub.f32 %v362_v48, %v364_v49  ;;  %v363_v54 = vmul.f32 0.03125, %v359_v51  ;;  %v365_v55 = vmul.f32 %v361_v52, %v361_v52  ;;  %v378_v18 = vsub.f32 %v2190_v19, %v361_v52 }
 0x13d   :  { %v372_v20 = vsub.f32 %v2157_v61, %v361_v52  ;;  %v374_v21 = vsub.f32 %v2161_v63, %v361_v52  ;;  %v376_v22 = vsub.f32 %v2177_v7, %v361_v52  ;;  %v398_v23 = vmul.f32 %v393_v11, %v371_v12 }
 0x13e   :  { %v368_v56 = vmax.f32 %v366_v53, 0.0  ;;  %v367_v58 = vsub.f32 %v363_v54, %v365_v55  ;;  %v400_v24 = vmul.f32 %v393_v11, %v373_v14  ;;  %v377_v26 = vsub.f32 %v2184_v13, %v360_v45 }
 0x13f   :  { %v375_v29 = vsub.f32 %v2167_v2, %v360_v45  ;;  %v405_v19 = vmul.f32 %v397_v17, %v378_v18  ;;  %v399_v30 = vmul.f32 %v397_v17, %v372_v20  ;;  %v401_v61 = vmul.f32 %v397_v17, %v374_v21 }
 0x140   :  { %v406_v59 = vadd.f32 1e-05, %v368_v56  ;;  %v369_v0 = vmax.f32 %v367_v58, 0.0  ;;  %v403_v31 = vmul.f32 %v397_v17, %v376_v22  ;;  %v404_v37 = vmul.f32 %v393_v11, %v377_v26  ;;  %v1877_v58 = vld [vmem:[%s2432_s3 + $0x10] sm:$0xff]  }
 0x141   :  { %v402_v38 = vmul.f32 %v393_v11, %v375_v29 }
 0x142   :  { %1940 = vrsqrt.f32 %v406_v59  ;;  %v407_v4 = vadd.f32 1e-05, %v369_v0  ;;  %v1878_v59 = vld [vmem:[%s2432_s3 + $0x8] sm:$0xff]   ;;  %v1879_v0 = vld [vmem:[%s2432_s3] sm:$0xff]  }
 0x144   :  { %1942 = vrsqrt.f32 %v407_v4 }
 0x14f   :  { %v1941_v25 = vpop.eup %1940 }
 0x150   :  { %v410_v27 = vmul.f32 %v1941_v25, %v398_v23  ;;  %v412_v28 = vmul.f32 %v1941_v25, %v400_v24  ;;  %v416_v42 = vmul.f32 %v1941_v25, %v404_v37  ;;  %v414_v44 = vmul.f32 %v1941_v25, %v402_v38 }
 0x151   :  { %v1943_v63 = vpop.eup %1942 }
 0x152   :  { %v436_v32 = vadd.f32 %v431_v60, %v410_v27  ;;  %v438_v7 = vadd.f32 %v431_v60, %v412_v28  ;;  %v417_v33 = vmul.f32 %v1943_v63, %v405_v19  ;;  %v411_v34 = vmul.f32 %v1943_v63, %v399_v30 }
 0x153   :  { %v413_v35 = vmul.f32 %v1943_v63, %v401_v61  ;;  %v415_v36 = vmul.f32 %v1943_v63, %v403_v31  ;;  %v440_v51 = vadd.f32 %v431_v60, %v414_v44  ;;  %v442_v52 = vadd.f32 %v431_v60, %v416_v42 }
 0x154   :  { %v437_v39 = vadd.f32 %v435_v62, %v411_v34  ;;  %v443_v41 = vadd.f32 %v435_v62, %v417_v33  ;;  %v444_v43 = vmax.f32 %v436_v32, 0.0  ;;  %v446_v2 = vmax.f32 %v438_v7, 0.0 }
 0x155   :  { %v439_v40 = vadd.f32 %v435_v62, %v413_v35  ;;  %v441_v13 = vadd.f32 %v435_v62, %v415_v36  ;;  %v448_v54 = vmax.f32 %v440_v51, 0.0  ;;  %v450_v55 = vmax.f32 %v442_v52, 0.0 }
 0x156   :  { %v445_v45 = vmax.f32 %v437_v39, 0.0  ;;  %v451_v48 = vmax.f32 %v443_v41, 0.0  ;;  %v452_v50 = vpack.c.bf16 %v446_v2, %v444_v43 }
 0x157   :  { %v447_v46 = vmax.f32 %v439_v40, 0.0  ;;  %v449_v47 = vmax.f32 %v441_v13, 0.0  ;;  %v454_v56 = vpack.c.bf16 %v450_v55, %v448_v54 }
 0x159   :  { %v453_v49 = vpack.c.bf16 %v447_v46, %v445_v45  ;;  %v455_v53 = vpack.c.bf16 %v451_v48, %v449_v47 }
 0x15b   :  { %616 = vmatprep.mubr.bf16.mxu1 %v453_v49  ;;  %v1693_v49 = vld [vmem:[%s2436_s7 + $0x4] sm:$0xf] }
 0x15c   :  { %617 = vmatmul.mubr.bf16.vlgmr.msra.gmra.mxu1 %v452_v50  ;;  %v678_v50 = vrot.slane %v1693_v49, %v2195_v1  ;;  %v692_v55 = vrot.slane %v1693_v49, %v2203_v8 }
 0x15d   :  { %624 = vmatprep.mubr.bf16.mxu1 %v455_v53  ;;  %1786 = vmatpush3.bf16.msra.mxu1 %v1876_v57 }
 0x15e   :  { %1787 = vmatprep.subr.bf16.mxu1 %v1877_v58 }
 0x161   :  { %1788 = vmatpush3.bf16.msra.mxu1 %v1877_v58 }
 0x162   :  { %1789 = vmatprep.subr.bf16.mxu1 %v1878_v59 }
 0x164   :  { %625 = vmatmul.mubr.bf16.gmra.mxu1 %v454_v56 }
 0x165   :  { %1790 = vmatpush3.bf16.msra.mxu1 %v1878_v59 }
 0x166   :  { %1791 = vmatprep.subr.bf16.mxu1 %v1879_v0 }
 0x169   :  { %1792 = vmatpush3.bf16.msra.mxu1 %v1879_v0 }
 0x21c   :  { %v1764_v3 = vpop.f32.mrf.mxu1 }
 0x21e   :  { %v1765_v4 = vpop.f32.mrf.mxu1 }
 0x21f   :  { %v1766_v11 = vadd.f32 %v1765_v4, %v1764_v3 }
 0x220   :  { %v1767_v6 = vpop.f32.mrf.mxu1 }
 0x221   :  { %v647_v17 = vmul.f32 %v1766_v11, %v1766_v11  ;;  %v634_v22 = vsel %vm633_vm0, %v1766_v11, 0.0 }
 0x222   :  { %v1768_v10 = vpop.f32.mrf.mxu1 }
 0x223   :  { %v1769_v12 = vadd.f32 %v1768_v10, %v1767_v6  ;;  %v651_v26 = vsel %vm633_vm0, %v647_v17, 0.0 }
 0x224   :  { %v1770_v14 = vpop.f32.mrf.mxu1 }
 0x225   :  { %v648_v15 = vmul.f32 %v1769_v12, %v1769_v12  ;;  %v635_v18 = vsel %vm633_vm0, %v1769_v12, 0.0 }
 0x226   :  { %v1771_v16 = vpop.f32.mrf.mxu1  ;;  %v636_v25 = vadd.f32 %v635_v18, %v634_v22 }
 0x227   :  { %v1772_v20 = vadd.f32 %v1771_v16, %v1770_v14  ;;  %v652_v23 = vsel %vm633_vm0, %v648_v15, 0.0 }
 0x228   :  { %v1773_v21 = vpop.f32.mrf.mxu1  ;;  %v653_v29 = vadd.f32 %v652_v23, %v651_v26  ;;  %v860_v23 = vld [vmem:[%s2433_s4] sm:$0xf] }
 0x229   :  { %v637_v24 = vsel %vm633_vm0, %v1772_v20, 0.0  ;;  %v649_v60 = vmul.f32 %v1772_v20, %v1772_v20  ;;  %1803 = vmatprep.subr.msk.bf16.mxu1 %vm867_vm1, %v860_v23 }
 0x22a   :  { %v1774_v62 = vpop.f32.mrf.mxu1  ;;  %v638_v19 = vadd.f32 %v637_v24, %v636_v25  ;;  %v869_v24 = vsel %vm867_vm1, %v860_v23, 0 }
 0x22b   :  { %v654_v27 = vsel %vm633_vm0, %v649_v60, 0.0  ;;  %v1775_v28 = vadd.f32 %v1774_v62, %v1773_v21 }
 0x22c   :  { %v655_v31 = vadd.f32 %v654_v27, %v653_v29 }
 0x22d   :  { %v639_v30 = vsel %vm633_vm0, %v1775_v28, 0.0  ;;  %v650_v61 = vmul.f32 %v1775_v28, %v1775_v28 }
 0x22e   :  { %v640_v63 = vadd.f32 %v639_v30, %v638_v19 }
 0x22f   :  { %v656_v32 = vsel %vm633_vm0, %v650_v61, 0.0 }
 0x230   :  { %v641_v7 = vrot.slane %v640_v63, 4  ;;  %v657_v33 = vadd.f32 %v656_v32, %v655_v31 }
 0x232   :  { %v642_v34 = vadd.f32 %v641_v7, %v640_v63  ;;  %v658_v35 = vrot.slane %v657_v33, 4 }
 0x234   :  { %v643_v36 = vrot.slane %v642_v34, 2  ;;  %v659_v37 = vadd.f32 %v658_v35, %v657_v33 }
 0x236   :  { %v644_v38 = vadd.f32 %v643_v36, %v642_v34  ;;  %v660_v39 = vrot.slane %v659_v37, 2 }
 0x238   :  { %v645_v40 = vrot.slane %v644_v38, 1  ;;  %v661_v13 = vadd.f32 %v660_v39, %v659_v37 }
 0x23a   :  { %v646_v41 = vadd.f32 %v645_v40, %v644_v38  ;;  %v662_v42 = vrot.slane %v661_v13, 1 }
 0x23c   :  { %v663_v43 = vadd.f32 %v662_v42, %v661_v13  ;;  %v664_v2 = vmul.f32 0.03125, %v646_v41 }
 0x23e   :  { %v665_v44 = vmul.f32 0.03125, %v663_v43  ;;  %v666_v45 = vmul.f32 %v664_v2, %v664_v2  ;;  %v673_v51 = vsub.f32 %v1772_v20, %v664_v2  ;;  %v674_v52 = vsub.f32 %v1775_v28, %v664_v2 }
 0x23f   :  { %v671_v53 = vsub.f32 %v1766_v11, %v664_v2  ;;  %v672_v54 = vsub.f32 %v1769_v12, %v664_v2 }
 0x240   :  { %v667_v46 = vsub.f32 %v665_v44, %v666_v45  ;;  %v681_v56 = vmul.f32 %v678_v50, %v673_v51  ;;  %v682_v57 = vmul.f32 %v678_v50, %v674_v52 }
 0x241   :  { %v679_v58 = vmul.f32 %v678_v50, %v671_v53  ;;  %v680_v59 = vmul.f32 %v678_v50, %v672_v54 }
 0x242   :  { %v668_v47 = vmax.f32 %v667_v46, 0.0 }
 0x244   :  { %v683_v48 = vadd.f32 1e-05, %v668_v47 }
 0x246   :  { %1944 = vrsqrt.f32 %v683_v48 }
 0x253   :  { %v1945_v0 = vpop.eup %1944 }
 0x254   :  { %v687_v3 = vmul.f32 %v1945_v0, %v681_v56  ;;  %v688_v4 = vmul.f32 %v1945_v0, %v682_v57  ;;  %v685_v6 = vmul.f32 %v1945_v0, %v679_v58  ;;  %v686_v10 = vmul.f32 %v1945_v0, %v680_v59  ;;  %v1700_v57 = vld [vmem:[%s2436_s7 + $0x8] sm:$0xf] }
 0x255   :  { %v835_v58 = vrot.slane %v1700_v57, %v2195_v1 }
 0x256   :  { %v695_v14 = vadd.f32 %v692_v55, %v687_v3  ;;  %v696_v15 = vadd.f32 %v692_v55, %v688_v4  ;;  %v693_v16 = vadd.f32 %v692_v55, %v685_v6  ;;  %v694_v17 = vadd.f32 %v692_v55, %v686_v10 }
 0x257   :  { %v849_v6 = vrot.slane %v1700_v57, %v2203_v8 }
 0x258   :  { %v699_v18 = vmax.f32 %v695_v14, 0.0  ;;  %v700_v20 = vmax.f32 %v696_v15, 0.0  ;;  %v697_v21 = vmax.f32 %v693_v16, 0.0  ;;  %v698_v11 = vmax.f32 %v694_v17, 0.0 }
 0x25a   :  { %v702_v12 = vpack.c.bf16 %v700_v20, %v699_v18  ;;  %v701_v22 = vpack.c.bf16 %v698_v11, %v697_v21 }
 0x25c   :  { %1793 = vmatprep.mubr.msk.bf16.mxu1 %vm633_vm0, %v701_v22 }
 0x25d   :  { %1794 = vmatmul.mubr.msk.bf16.vlgmr.msra.gmra.mxu1 %vm633_vm0, %v702_v12 }
 0x25e   :  { %1798 = vmatpush3.bf16.msra.mxu1 %v869_v24 }
 0x31d   :  { %v1795_v60 = vpop.f32.mrf.mxu1 }
 0x31e   :  { %v806_v28 = vmul.f32 %v1795_v60, %v1795_v60  ;;  %v794_v31 = vsel %vm790_vm2, %v1795_v60, 0.0 }
 0x31f   :  { %v775_v25 = vpop.f32.mrf.mxu1 }
 0x320   :  { %v804_v26 = vmul.f32 %v775_v25, %v775_v25  ;;  %v791_v29 = vsel %vm790_vm2, %v775_v25, 0.0  ;;  %v811_v35 = vsel %vm790_vm2, %v806_v28, 0.0 }
 0x321   :  { %v1796_v62 = vpop.f32.mrf.mxu1 }
 0x322   :  { %v808_v63 = vsel %vm790_vm2, %v804_v26, 0.0  ;;  %v807_v32 = vmul.f32 %v1796_v62, %v1796_v62  ;;  %v796_v36 = vsel %vm790_vm2, %v1796_v62, 0.0 }
 0x323   :  { %v778_v27 = vpop.f32.mrf.mxu1 }
 0x324   :  { %v792_v19 = vsel %vm790_vm2, %v778_v27, 0.0  ;;  %v805_v30 = vmul.f32 %v778_v27, %v778_v27  ;;  %v813_v39 = vsel %vm790_vm2, %v807_v32, 0.0  ;;  %v1889_v32 = vld [vmem:[%s2434_s5] ss:$8 sps:$4 sm:$0xff]  }
 0x325   :  { %v793_v61 = vadd.f32 %v792_v19, %v791_v29  ;;  %v1882_v29 = vld [vmem:[%s2434_s5 + $0x34] ss:$8 sps:$4 sm:$0xff]   ;;  %v1880_v19 = vld [vmem:[%s2434_s5 + $0x30] ss:$8 sps:$4 sm:$0xff]  }
 0x326   :  { %v809_v7 = vsel %vm790_vm2, %v805_v30, 0.0  ;;  %1051 = vmatprep.subr.bf16.mxu1 %v1882_v29  ;;  %v1885_v30 = vld [vmem:[%s2434_s5 + $0x24] ss:$8 sps:$4 sm:$0xff]  }
 0x327   :  { %v795_v33 = vadd.f32 %v794_v31, %v793_v61  ;;  %v810_v34 = vadd.f32 %v809_v7, %v808_v63  ;;  %v1883_v61 = vld [vmem:[%s2434_s5 + $0x20] ss:$8 sps:$4 sm:$0xff]   ;;  %v1888_v31 = vld [vmem:[%s2434_s5 + $0x14] ss:$8 sps:$4 sm:$0xff]   ;;  %v1886_v63 = vld [vmem:[%s2434_s5 + $0x10] ss:$8 sps:$4 sm:$0xff]  }
 0x328   :  { %v1891_v7 = vld [vmem:[%s2434_s5 + $0x4] ss:$8 sps:$4 sm:$0xff]  }
 0x329   :  { %v797_v37 = vadd.f32 %v796_v36, %v795_v33  ;;  %v812_v38 = vadd.f32 %v811_v35, %v810_v34  ;;  %v2028_v33 = vmov 0   ;;  %v1892_v34 = vld [vmem:[#allocation5 + $0x70] ss:$8 sps:$4 sm:$0xff]   ;;  %v1894_v35 = vld [vmem:[#allocation5 + $0x74] ss:$8 sps:$4 sm:$0xff]  }
 0x32a   :  { %1429 = vmatprep.subr.bf16.mxu0 %v1894_v35 }
 0x32b   :  { %v798_v40 = vrot.slane %v797_v37, 4  ;;  %v814_v13 = vadd.f32 %v813_v39, %v812_v38  ;;  %1430 = vmatpush1.bf16.msra.mxu0 %v1892_v34 }
 0x32d   :  { %v799_v41 = vadd.f32 %v798_v40, %v797_v37  ;;  %v815_v42 = vrot.slane %v814_v13, 4 }
 0x32f   :  { %v800_v43 = vrot.slane %v799_v41, 2  ;;  %v816_v2 = vadd.f32 %v815_v42, %v814_v13 }
 0x331   :  { %v801_v44 = vadd.f32 %v800_v43, %v799_v41  ;;  %v817_v45 = vrot.slane %v816_v2, 2 }
 0x333   :  { %v802_v46 = vrot.slane %v801_v44, 1  ;;  %v818_v47 = vadd.f32 %v817_v45, %v816_v2 }
 0x335   :  { %v803_v48 = vadd.f32 %v802_v46, %v801_v44  ;;  %v819_v49 = vrot.slane %v818_v47, 1 }
 0x337   :  { %v820_v50 = vadd.f32 %v819_v49, %v818_v47  ;;  %v821_v51 = vmul.f32 0.03125, %v803_v48 }
 0x339   :  { %v822_v52 = vmul.f32 0.03125, %v820_v50  ;;  %v823_v53 = vmul.f32 %v821_v51, %v821_v51  ;;  %v829_v59 = vsub.f32 %v778_v27, %v821_v51  ;;  %v828_v0 = vsub.f32 %v775_v25, %v821_v51 }
 0x33a   :  { %v830_v3 = vsub.f32 %v1795_v60, %v821_v51  ;;  %v831_v4 = vsub.f32 %v1796_v62, %v821_v51 }
 0x33b   :  { %v824_v54 = vsub.f32 %v822_v52, %v823_v53  ;;  %v837_v10 = vmul.f32 %v835_v58, %v829_v59  ;;  %v836_v14 = vmul.f32 %v835_v58, %v828_v0 }
 0x33c   :  { %v838_v15 = vmul.f32 %v835_v58, %v830_v3  ;;  %v839_v16 = vmul.f32 %v835_v58, %v831_v4 }
 0x33d   :  { %v825_v55 = vmax.f32 %v824_v54, 0.0 }
 0x33f   :  { %v840_v56 = vadd.f32 1e-05, %v825_v55 }
 0x341   :  { %1946 = vrsqrt.f32 %v840_v56 }
 0x34e   :  { %v1947_v17 = vpop.eup %1946 }
 0x34f   :  { %v843_v18 = vmul.f32 %v1947_v17, %v837_v10  ;;  %v842_v20 = vmul.f32 %v1947_v17, %v836_v14  ;;  %v844_v21 = vmul.f32 %v1947_v17, %v838_v15  ;;  %v845_v11 = vmul.f32 %v1947_v17, %v839_v16 }
 0x351   :  { %v851_v12 = vadd.f32 %v849_v6, %v843_v18  ;;  %v850_v22 = vadd.f32 %v849_v6, %v842_v20  ;;  %v852_v23 = vadd.f32 %v849_v6, %v844_v21  ;;  %v853_v24 = vadd.f32 %v849_v6, %v845_v11 }
 0x353   :  { %v854_v26 = vmax.f32 %v850_v22, 0.0  ;;  %v855_v27 = vmax.f32 %v851_v12, 0.0  ;;  %v856_v25 = vmax.f32 %v852_v23, 0.0  ;;  %v857_v60 = vmax.f32 %v853_v24, 0.0  ;;  %v1703_v22 = vld [vmem:[%s2436_s7 + $0xc] sm:$0xf] }
 0x354   :  { %v964_v24 = vrot.slane %v1703_v22, %v2195_v1 }
 0x355   :  { %v858_v62 = vpack.c.bf16 %v855_v27, %v854_v26  ;;  %v859_v28 = vpack.c.bf16 %v857_v60, %v856_v25 }
 0x357   :  { %1799 = vmatprep.mubr.msk.bf16.mxu1 %vm790_vm2, %v858_v62  ;;  %v978_v62 = vrot.slane %v1703_v22, %v2203_v8 }
 0x358   :  { %1800 = vmatmul.mubr.msk.bf16.vlgmr.msra.gmra.mxu1 %vm790_vm2, %v859_v28 }
 0x359   :  { %1052 = vmatpush1.bf16.msra.mxu1 %v1880_v19  ;;  %1075 = vmatprep.mubr.bf16.mxu1 %v2028_v33 }
 0x35a   :  { %1053 = vmatprep.subr.bf16.mxu1 %v1885_v30 }
 0x35d   :  { %1054 = vmatpush1.bf16.msra.mxu1 %v1883_v61 }
 0x35e   :  { %1055 = vmatprep.subr.bf16.mxu1 %v1888_v31 }
 0x361   :  { %1056 = vmatpush1.bf16.msra.mxu1 %v1886_v63 }
 0x362   :  { %1057 = vmatprep.subr.bf16.mxu1 %v1891_v7 }
 0x365   :  { %1058 = vmatpush1.bf16.msra.mxu1 %v1889_v32 }
 0x418   :  { %v1801_v36 = vpop.f32.mrf.mxu1 }
 0x419   :  { %v935_v13 = vmul.f32 %v1801_v36, %v1801_v36  ;;  %v923_v44 = vsel %vm633_vm0, %v1801_v36, 0.0 }
 0x41a   :  { %v905_v37 = vpop.f32.mrf.mxu1 }
 0x41b   :  { %v933_v39 = vmul.f32 %v905_v37, %v905_v37  ;;  %v920_v41 = vsel %vm633_vm0, %v905_v37, 0.0  ;;  %v940_v50 = vsel %vm633_vm0, %v935_v13, 0.0 }
 0x41c   :  { %v1802_v38 = vpop.f32.mrf.mxu1 }
 0x41d   :  { %v937_v45 = vsel %vm633_vm0, %v933_v39, 0.0  ;;  %v936_v46 = vmul.f32 %v1802_v38, %v1802_v38  ;;  %v925_v51 = vsel %vm633_vm0, %v1802_v38, 0.0 }
 0x41e   :  { %v908_v40 = vpop.f32.mrf.mxu1 }
 0x41f   :  { %v921_v42 = vsel %vm633_vm0, %v908_v40, 0.0  ;;  %v934_v43 = vmul.f32 %v908_v40, %v908_v40  ;;  %v942_v54 = vsel %vm633_vm0, %v936_v46, 0.0  ;;  %v1901_v46 = vld [vmem:[#allocation5 + $0x40] ss:$8 sps:$4 sm:$0xff]  }
 0x420   :  { %v922_v2 = vadd.f32 %v921_v42, %v920_v41  ;;  %v1895_v42 = vld [vmem:[#allocation5 + $0x60] ss:$8 sps:$4 sm:$0xff]  }
 0x421   :  { %v938_v47 = vsel %vm633_vm0, %v934_v43, 0.0  ;;  %v1897_v43 = vld [vmem:[#allocation5 + $0x64] ss:$8 sps:$4 sm:$0xff]  }
 0x422   :  { %v924_v48 = vadd.f32 %v923_v44, %v922_v2  ;;  %v939_v49 = vadd.f32 %v938_v47, %v937_v45  ;;  %1431 = vmatprep.subr.bf16.mxu0 %v1897_v43  ;;  %v1900_v2 = vld [vmem:[#allocation5 + $0x54] ss:$8 sps:$4 sm:$0xff]   ;;  %v1898_v44 = vld [vmem:[#allocation5 + $0x50] ss:$8 sps:$4 sm:$0xff]   ;;  %v1903_v45 = vld [vmem:[#allocation5 + $0x44] ss:$8 sps:$4 sm:$0xff]  }
 0x423   :  { %1432 = vmatpush1.bf16.msra.mxu0 %v1895_v42  ;;  %v1906_v47 = vld [vmem:[#allocation5 + $0x34] ss:$8 sps:$4 sm:$0xff]  }
 0x424   :  { %v926_v52 = vadd.f32 %v925_v51, %v924_v48  ;;  %v941_v53 = vadd.f32 %v940_v50, %v939_v49  ;;  %1433 = vmatprep.subr.bf16.mxu0 %v1900_v2  ;;  %v1904_v48 = vld [vmem:[#allocation5 + $0x30] ss:$8 sps:$4 sm:$0xff]   ;;  %v1907_v49 = vld [vmem:[#allocation5 + $0x20] ss:$8 sps:$4 sm:$0xff]   ;;  %v1912_v50 = vld [vmem:[#allocation5 + $0x14] ss:$8 sps:$4 sm:$0xff]  }
 0x425   :  { %v1910_v51 = vld [vmem:[#allocation5 + $0x10] ss:$8 sps:$4 sm:$0xff]  }
 0x426   :  { %v927_v55 = vrot.slane %v926_v52, 4  ;;  %v943_v56 = vadd.f32 %v942_v54, %v941_v53  ;;  %v1913_v53 = vld [vmem:[#allocation5] ss:$8 sps:$4 sm:$0xff]   ;;  %v1918_v54 = vld [vmem:[#allocation5 + $0xf4] ss:$8 sps:$4 sm:$0xff]  }
 0x427   :  { %1434 = vmatpush1.bf16.msra.mxu0 %v1898_v44 }
 0x428   :  { %v928_v57 = vadd.f32 %v927_v55, %v926_v52  ;;  %v944_v58 = vrot.slane %v943_v56, 4  ;;  %1435 = vmatprep.subr.bf16.mxu0 %v1903_v45  ;;  %v1915_v52 = vld [vmem:[#allocation5 + $0x4] ss:$8 sps:$4 sm:$0xff]   ;;  %v1916_v55 = vld [vmem:[#allocation5 + $0xf0] ss:$8 sps:$4 sm:$0xff]  }
 0x42a   :  { %v929_v59 = vrot.slane %v928_v57, 2  ;;  %v945_v0 = vadd.f32 %v944_v58, %v943_v56  ;;  %v1921_v56 = vld [vmem:[#allocation5 + $0xe4] ss:$8 sps:$4 sm:$0xff]   ;;  %v1924_v58 = vld [vmem:[#allocation5 + $0xd4] ss:$8 sps:$4 sm:$0xff]  }
 0x42b   :  { %1436 = vmatpush1.bf16.msra.mxu0 %v1901_v46 }
 0x42c   :  { %v930_v3 = vadd.f32 %v929_v59, %v928_v57  ;;  %v946_v4 = vrot.slane %v945_v0, 2  ;;  %1437 = vmatprep.subr.bf16.mxu0 %v1906_v47  ;;  %v1919_v57 = vld [vmem:[#allocation5 + $0xe0] ss:$8 sps:$4 sm:$0xff]   ;;  %v1922_v59 = vld [vmem:[#allocation5 + $0xd0] ss:$8 sps:$4 sm:$0xff]  }
 0x42e   :  { %v931_v6 = vrot.slane %v930_v3, 1  ;;  %v947_v10 = vadd.f32 %v946_v4, %v945_v0  ;;  %v1927_v0 = vld [vmem:[#allocation5 + $0xc4] ss:$8 sps:$4 sm:$0xff]   ;;  %v1930_v4 = vld [vmem:[#allocation5 + $0xb4] ss:$8 sps:$4 sm:$0xff]  }
 0x42f   :  { %1438 = vmatpush1.bf16.msra.mxu0 %v1904_v48 }
 0x430   :  { %v932_v14 = vadd.f32 %v931_v6, %v930_v3  ;;  %v948_v15 = vrot.slane %v947_v10, 1  ;;  %v1925_v3 = vld [vmem:[#allocation5 + $0xc0] ss:$8 sps:$4 sm:$0xff]   ;;  %v1928_v6 = vld [vmem:[#allocation5 + $0xb0] ss:$8 sps:$4 sm:$0xff]  }
 0x432   :  { %v949_v16 = vadd.f32 %v948_v15, %v947_v10  ;;  %v950_v17 = vmul.f32 0.03125, %v932_v14  ;;  %v1933_v10 = vld [vmem:[#allocation5 + $0xa4] ss:$8 sps:$4 sm:$0xff]   ;;  %v1931_v14 = vld [vmem:[#allocation5 + $0xa0] ss:$8 sps:$4 sm:$0xff]  }
 0x433   :  { %v1934_v15 = vld [vmem:[#allocation5 + $0x90] ss:$8 sps:$4 sm:$0xff]  }
 0x434   :  { %v951_v18 = vmul.f32 0.03125, %v949_v16  ;;  %v952_v20 = vmul.f32 %v950_v17, %v950_v17  ;;  %v958_v23 = vsub.f32 %v908_v40, %v950_v17  ;;  %v957_v26 = vsub.f32 %v905_v37, %v950_v17  ;;  %v1936_v16 = vld [vmem:[#allocation5 + $0x94] ss:$8 sps:$4 sm:$0xff]  }
 0x435   :  { %v959_v27 = vsub.f32 %v1801_v36, %v950_v17  ;;  %v960_v25 = vsub.f32 %v1802_v38, %v950_v17  ;;  %v1939_v17 = vld [vmem:[#allocation5 + $0x84] ss:$8 sps:$4 sm:$0xff]  }
 0x436   :  { %v953_v21 = vsub.f32 %v951_v18, %v952_v20  ;;  %v966_v60 = vmul.f32 %v964_v24, %v958_v23  ;;  %v965_v28 = vmul.f32 %v964_v24, %v957_v26  ;;  %v1937_v18 = vld [vmem:[#allocation5 + $0x80] ss:$8 sps:$4 sm:$0xff]  }
 0x437   :  { %v967_v61 = vmul.f32 %v964_v24, %v959_v27  ;;  %v968_v31 = vmul.f32 %v964_v24, %v960_v25 }
 0x438   :  { %v954_v11 = vmax.f32 %v953_v21, 0.0 }
 0x43a   :  { %v969_v12 = vadd.f32 1e-05, %v954_v11 }
 0x43c   :  { %1948 = vrsqrt.f32 %v969_v12 }
 0x449   :  { %v1949_v29 = vpop.eup %1948 }
 0x44a   :  { %v972_v19 = vmul.f32 %v1949_v29, %v966_v60  ;;  %v971_v30 = vmul.f32 %v1949_v29, %v965_v28  ;;  %v973_v7 = vmul.f32 %v1949_v29, %v967_v61  ;;  %v974_v34 = vmul.f32 %v1949_v29, %v968_v31 }
 0x44c   :  { %v980_v63 = vadd.f32 %v978_v62, %v972_v19  ;;  %v979_v32 = vadd.f32 %v978_v62, %v971_v30  ;;  %v981_v13 = vadd.f32 %v978_v62, %v973_v7  ;;  %v982_v37 = vadd.f32 %v978_v62, %v974_v34 }
 0x44e   :  { %v984_v35 = vmax.f32 %v980_v63, 0.0  ;;  %v983_v39 = vmax.f32 %v979_v32, 0.0  ;;  %v985_v36 = vmax.f32 %v981_v13, 0.0  ;;  %v986_v38 = vmax.f32 %v982_v37, 0.0 }
 0x450   :  { %v987_v40 = vpack.c.bf16 %v984_v35, %v983_v39  ;;  %v988_v41 = vpack.c.bf16 %v986_v38, %v985_v36 }
 0x452   :  { %1712 = vmatmul.mubr.msk.bf16.vlgmr.msra.gmra.mxu1 %vm633_vm0, %v987_v40 }
 0x453   :  { %1085 = vmatprep.mubr.bf16.mxu1 %v2028_v33  ;;  %v1909_v33 = vld [vmem:[#allocation5 + $0x24] ss:$8 sps:$4 sm:$0xff]  }
 0x454   :  { %1439 = vmatprep.subr.bf16.mxu0 %v1909_v33 }
 0x455   :  { %1440 = vmatpush1.bf16.msra.mxu0 %v1907_v49 }
 0x456   :  { %1441 = vmatprep.subr.bf16.mxu0 %v1912_v50 }
 0x459   :  { %1442 = vmatpush1.bf16.msra.mxu0 %v1910_v51 }
 0x45a   :  { %1713 = vmatmul.mubr.msk.bf16.gmra.mxu1 %vm633_vm0, %v988_v41  ;;  %1443 = vmatprep.subr.bf16.mxu0 %v1915_v52 }
 0x45d   :  { %1444 = vmatpush1.bf16.msra.mxu0 %v1913_v53 }
 0x45e   :  { %1445 = vmatprep.subr.bf16.mxu0 %v1918_v54 }
 0x461   :  { %1446 = vmatpush2.bf16.msra.mxu0 %v1916_v55 }
 0x462   :  { %1447 = vmatprep.subr.bf16.mxu0 %v1921_v56 }
 0x465   :  { %1448 = vmatpush2.bf16.msra.mxu0 %v1919_v57 }
 0x466   :  { %1449 = vmatprep.subr.bf16.mxu0 %v1924_v58 }
 0x469   :  { %1450 = vmatpush2.bf16.msra.mxu0 %v1922_v59 }
 0x46a   :  { %1451 = vmatprep.subr.bf16.mxu0 %v1927_v0 }
 0x46d   :  { %1452 = vmatpush2.bf16.msra.mxu0 %v1925_v3 }
 0x46e   :  { %1453 = vmatprep.subr.bf16.mxu0 %v1930_v4 }
 0x471   :  { %1454 = vmatpush2.bf16.msra.mxu0 %v1928_v6 }
 0x472   :  { %1455 = vmatprep.subr.bf16.mxu0 %v1933_v10 }
 0x475   :  { %1456 = vmatpush2.bf16.msra.mxu0 %v1931_v14 }
 0x476   :  { %1457 = vmatprep.subr.bf16.mxu0 %v1936_v16 }
 0x479   :  { %1458 = vmatpush2.bf16.msra.mxu0 %v1934_v15 }
 0x47a   :  { %1459 = vmatprep.subr.bf16.mxu0 %v1939_v17 }
 0x47d   :  { %1460 = vmatpush2.bf16.msra.mxu0 %v1937_v18 }
 0x512   :  { %v2308_v20 = vpop.f32.mrf.mxu1 }
 0x513   :  { %v1114_v26 = vmul.f32 %v2308_v20, %v2308_v20 }
 0x514   :  { %v2310_v21 = vpop.f32.mrf.mxu1 }
 0x515   :  { %v1115_v60 = vmul.f32 %v2310_v21, %v2310_v21 }
 0x516   :  { %v2312_v11 = vpop.f32.mrf.mxu1 }
 0x517   :  { %v1116_v22 = vmul.f32 %v2312_v11, %v2312_v11  ;;  %v1096_v27 = vadd.f32 %v2312_v11, %v2308_v20 }
 0x518   :  { %v2314_v12 = vpop.f32.mrf.mxu1 }
 0x519   :  { %v1117_v23 = vmul.f32 %v2314_v12, %v2314_v12  ;;  %v1122_v28 = vadd.f32 %v1116_v22, %v1114_v26  ;;  %v1105_v29 = vadd.f32 %v2314_v12, %v2310_v21 }
 0x51a   :  { %v2320_v24 = vpop.f32.mrf.mxu1 }
 0x51b   :  { %v1118_v25 = vmul.f32 %v2320_v24, %v2320_v24  ;;  %v1097_v19 = vadd.f32 %v1096_v27, %v2320_v24  ;;  %v1131_v61 = vadd.f32 %v1117_v23, %v1115_v60  ;;  %v1714_v27 = vld [vmem:[%s2436_s7 + $0x10] sm:$0xf] }
 0x51c   :  { %v2330_v62 = vpop.f32.mrf.mxu1  ;;  %v1164_v60 = vrot.slane %v1714_v27, %v2195_v1 }
 0x51d   :  { %v1119_v30 = vmul.f32 %v2330_v62, %v2330_v62  ;;  %v1123_v63 = vadd.f32 %v1122_v28, %v1118_v25  ;;  %v1106_v32 = vadd.f32 %v1105_v29, %v2330_v62  ;;  %v1168_v28 = vrot.slane %v1714_v27, %v2200_v5 }
 0x51e   :  { %v2337_v31 = vpop.f32.mrf.mxu1  ;;  %v1174_v29 = vrot.slane %v1164_v60, %v2195_v1 }
 0x51f   :  { %v1098_v7 = vadd.f32 %v1097_v19, %v2337_v31  ;;  %v1120_v34 = vmul.f32 %v2337_v31, %v2337_v31  ;;  %v1132_v35 = vadd.f32 %v1131_v61, %v1119_v30  ;;  %v1202_v19 = vrot.slane %v1714_v27, %v2203_v8 }
 0x520   :  { %v2343_v39 = vpop.f32.mrf.mxu1 }
 0x521   :  { %v1099_v40 = vrot.slane %v1098_v7, 4  ;;  %v1124_v13 = vadd.f32 %v1123_v63, %v1120_v34  ;;  %v1107_v37 = vadd.f32 %v1106_v32, %v2343_v39  ;;  %v1121_v36 = vmul.f32 %v2343_v39, %v2343_v39 }
 0x522   :  { %v1206_v63 = vrot.slane %v1714_v27, %v2205_v9  ;;  %v1178_v32 = vrot.slane %v1168_v28, %v2195_v1 }
 0x523   :  { %v1100_v38 = vadd.f32 %v1099_v40, %v1098_v7  ;;  %v1125_v41 = vrot.slane %v1124_v13, 4  ;;  %v1108_v42 = vrot.slane %v1107_v37, 4  ;;  %v1133_v43 = vadd.f32 %v1132_v35, %v1121_v36 }
 0x524   :  { %v1212_v36 = vrot.slane %v1202_v19, %v2203_v8 }
 0x525   :  { %v1101_v2 = vrot.slane %v1100_v38, 2  ;;  %v1126_v44 = vadd.f32 %v1125_v41, %v1124_v13  ;;  %v1109_v45 = vadd.f32 %v1108_v42, %v1107_v37  ;;  %v1134_v46 = vrot.slane %v1133_v43, 4 }
 0x527   :  { %v1102_v47 = vadd.f32 %v1101_v2, %v1100_v38  ;;  %v1127_v48 = vrot.slane %v1126_v44, 2  ;;  %v1110_v33 = vrot.slane %v1109_v45, 2  ;;  %v1135_v49 = vadd.f32 %v1134_v46, %v1133_v43 }
 0x529   :  { %v1103_v50 = vrot.slane %v1102_v47, 1  ;;  %v1128_v51 = vadd.f32 %v1127_v48, %v1126_v44  ;;  %v1111_v52 = vadd.f32 %v1110_v33, %v1109_v45  ;;  %v1136_v53 = vrot.slane %v1135_v49, 2 }
 0x52b   :  { %v1104_v54 = vadd.f32 %v1103_v50, %v1102_v47  ;;  %v1129_v55 = vrot.slane %v1128_v51, 1  ;;  %v1112_v56 = vrot.slane %v1111_v52, 1  ;;  %v1137_v57 = vadd.f32 %v1136_v53, %v1135_v49 }
 0x52d   :  { %v1130_v58 = vadd.f32 %v1129_v55, %v1128_v51  ;;  %v1140_v59 = vmul.f32 0.03125, %v1104_v54  ;;  %v1113_v0 = vadd.f32 %v1112_v56, %v1111_v52  ;;  %v1138_v3 = vrot.slane %v1137_v57, 1 }
 0x52f   :  { %v1142_v4 = vmul.f32 0.03125, %v1130_v58  ;;  %v1144_v6 = vmul.f32 %v1140_v59, %v1140_v59  ;;  %v1139_v10 = vadd.f32 %v1138_v3, %v1137_v57  ;;  %v1141_v14 = vmul.f32 0.03125, %v1113_v0 }
 0x530   :  { %v1152_v30 = vsub.f32 %v2308_v20, %v1140_v59  ;;  %v1154_v61 = vsub.f32 %v2312_v11, %v1140_v59  ;;  %v1216_v20 = vrot.slane %v1206_v63, %v2203_v8  ;;  %v1158_v11 = vsub.f32 %v2337_v31, %v1140_v59 }
 0x531   :  { %v1146_v15 = vsub.f32 %v1142_v4, %v1144_v6  ;;  %v1143_v16 = vmul.f32 0.03125, %v1139_v10  ;;  %v1145_v17 = vmul.f32 %v1141_v14, %v1141_v14  ;;  %v1159_v7 = vsub.f32 %v2343_v39, %v1141_v14 }
 0x532   :  { %v1153_v34 = vsub.f32 %v2310_v21, %v1141_v14  ;;  %v1155_v35 = vsub.f32 %v2314_v12, %v1141_v14  ;;  %v1157_v40 = vsub.f32 %v2330_v62, %v1141_v14  ;;  %v1179_v13 = vmul.f32 %v1174_v29, %v1152_v30 }
 0x533   :  { %v1148_v18 = vmax.f32 %v1146_v15, 0.0  ;;  %v1147_v22 = vsub.f32 %v1143_v16, %v1145_v17  ;;  %v1181_v37 = vmul.f32 %v1174_v29, %v1154_v61  ;;  %v1156_v43 = vsub.f32 %v2320_v24, %v1140_v59 }
 0x534   :  { %v1186_v39 = vmul.f32 %v1178_v32, %v1159_v7  ;;  %v1180_v2 = vmul.f32 %v1178_v32, %v1153_v34  ;;  %v1182_v21 = vmul.f32 %v1178_v32, %v1155_v35  ;;  %v1184_v44 = vmul.f32 %v1178_v32, %v1157_v40 }
 0x535   :  { %v1187_v23 = vadd.f32 1e-05, %v1148_v18  ;;  %v1149_v26 = vmax.f32 %v1147_v22, 0.0  ;;  %v1185_v49 = vmul.f32 %v1174_v29, %v1158_v11  ;;  %v1183_v50 = vmul.f32 %v1174_v29, %v1156_v43 }
 0x537   :  { %1950 = vrsqrt.f32 %v1187_v23  ;;  %v1188_v25 = vadd.f32 1e-05, %v1149_v26 }
 0x539   :  { %1952 = vrsqrt.f32 %v1188_v25 }
 0x544   :  { %v1951_v38 = vpop.eup %1950 }
 0x545   :  { %v1191_v41 = vmul.f32 %v1951_v38, %v1179_v13  ;;  %v1193_v42 = vmul.f32 %v1951_v38, %v1181_v37  ;;  %v1197_v54 = vmul.f32 %v1951_v38, %v1185_v49  ;;  %v1195_v56 = vmul.f32 %v1951_v38, %v1183_v50 }
 0x546   :  { %v1953_v12 = vpop.eup %1952 }
 0x547   :  { %v1217_v45 = vadd.f32 %v1212_v36, %v1191_v41  ;;  %v1219_v62 = vadd.f32 %v1212_v36, %v1193_v42  ;;  %v1198_v46 = vmul.f32 %v1953_v12, %v1186_v39  ;;  %v1192_v47 = vmul.f32 %v1953_v12, %v1180_v2 }
 0x548   :  { %v1194_v48 = vmul.f32 %v1953_v12, %v1182_v21  ;;  %v1196_v33 = vmul.f32 %v1953_v12, %v1184_v44  ;;  %v1221_v6 = vadd.f32 %v1212_v36, %v1195_v56  ;;  %v1223_v10 = vadd.f32 %v1212_v36, %v1197_v54 }
 0x549   :  { %v1218_v51 = vadd.f32 %v1216_v20, %v1192_v47  ;;  %v1224_v53 = vadd.f32 %v1216_v20, %v1198_v46  ;;  %v1225_v55 = vmax.f32 %v1217_v45, 0.0  ;;  %v1227_v24 = vmax.f32 %v1219_v62, 0.0 }
 0x54a   :  { %v1220_v52 = vadd.f32 %v1216_v20, %v1194_v48  ;;  %v1222_v31 = vadd.f32 %v1216_v20, %v1196_v33  ;;  %v1229_v15 = vmax.f32 %v1221_v6, 0.0  ;;  %v1231_v16 = vmax.f32 %v1223_v10, 0.0 }
 0x54b   :  { %v1226_v57 = vmax.f32 %v1218_v51, 0.0  ;;  %v1232_v0 = vmax.f32 %v1224_v53, 0.0  ;;  %v1233_v4 = vpack.c.bf16 %v1227_v24, %v1225_v55 }
 0x54c   :  { %v1228_v58 = vmax.f32 %v1220_v52, 0.0  ;;  %v1230_v59 = vmax.f32 %v1222_v31, 0.0  ;;  %v1235_v17 = vpack.c.bf16 %v1231_v16, %v1229_v15 }
 0x54e   :  { %v1234_v3 = vpack.c.bf16 %v1228_v58, %v1226_v57  ;;  %v1236_v14 = vpack.c.bf16 %v1232_v0, %v1230_v59 }
 0x550   :  { %1461 = vmatprep.mubr.bf16.mxu0 %v1234_v3 }
 0x551   :  { %1462 = vmatmul.mubr.bf16.vlgmr.msra.gmra.mxu0 %v1233_v4 }
 0x552   :  { %1471 = vmatprep.mubr.bf16.mxu0 %v1236_v14 }
 0x559   :  { %1472 = vmatmul.mubr.bf16.gmra.mxu0 %v1235_v17 }
 0x611   :  { %v2367_v18 = vpop.f32.mrf.mxu0 }
 0x612   :  { %v1500_v28 = vmul.f32 %v2367_v18, %v2367_v18 }
 0x613   :  { %v2369_v22 = vpop.f32.mrf.mxu0 }
 0x614   :  { %v1501_v30 = vmul.f32 %v2369_v22, %v2369_v22 }
 0x615   :  { %v2371_v23 = vpop.f32.mrf.mxu0 }
 0x616   :  { %v1502_v27 = vmul.f32 %v2371_v23, %v2371_v23  ;;  %v1482_v29 = vadd.f32 %v2371_v23, %v2367_v18 }
 0x617   :  { %v2373_v26 = vpop.f32.mrf.mxu0 }
 0x618   :  { %v1503_v25 = vmul.f32 %v2373_v26, %v2373_v26  ;;  %v1508_v63 = vadd.f32 %v1502_v27, %v1500_v28  ;;  %v1491_v32 = vadd.f32 %v2373_v26, %v2369_v22 }
 0x619   :  { %v2379_v60 = vpop.f32.mrf.mxu0 }
 0x61a   :  { %v1504_v19 = vmul.f32 %v2379_v60, %v2379_v60  ;;  %v1483_v7 = vadd.f32 %v1482_v29, %v2379_v60  ;;  %v1517_v35 = vadd.f32 %v1503_v25, %v1501_v30  ;;  %v1747_v29 = vld [vmem:[%s2436_s7 + $0x14] sm:$0xf]  ;;  %s2029_s7 = smov [#allocation7]  }
 0x61b   :  { %v2389_v61 = vpop.f32.mrf.mxu0  ;;  %v1550_v30 = vrot.slane %v1747_v29, %v2195_v1  ;;  %s1632_s21 = sshll.u32 %s2029_s7, 4  ;;  %s1633_s21 = int_to_ptr.vmem [resolvable:$true] %s1632_s21 }
 0x61c   :  { %v1505_v34 = vmul.f32 %v2389_v61, %v2389_v61  ;;  %v1509_v13 = vadd.f32 %v1508_v63, %v1504_v19  ;;  %v1492_v37 = vadd.f32 %v1491_v32, %v2389_v61  ;;  %v1588_v63 = vrot.slane %v1747_v29, %v2203_v8  ;;  %s1998_s3 = scalar_lea.vmem %s1633_s21, 1024  ;;  %p2003_p11 = scmp.lt.s32.totalorder %s1633_s21, %s1633_s21 }
 0x61d   :  { %v2396_v40 = vpop.f32.mrf.mxu0  ;;  %v1554_v32 = vrot.slane %v1747_v29, %v2200_v5  ;;  %p1999_p10 = scmp.ne.s32.totalorder %s1633_s21, %s1998_s3  ;;  %p2004_p12 = scmp.lt.s32.totalorder %s1998_s3, %s1998_s3 }
 0x61e   :  { %v1484_v36 = vadd.f32 %v1483_v7, %v2396_v40  ;;  %v1506_v38 = vmul.f32 %v2396_v40, %v2396_v40  ;;  %v1518_v20 = vadd.f32 %v1517_v35, %v1505_v34  ;;  %v1560_v7 = vrot.slane %v1550_v30, %v2195_v1 }
 0x61f   :  { %v2402_v11 = vpop.f32.mrf.mxu0  ;;  %p2005_p13 = por %p2004_p12, %p2003_p11 }
 0x620   :  { %v1485_v41 = vrot.slane %v1484_v36, 4  ;;  %v1510_v42 = vadd.f32 %v1509_v13, %v1506_v38  ;;  %v1493_v43 = vadd.f32 %v1492_v37, %v2402_v11  ;;  %v1507_v39 = vmul.f32 %v2402_v11, %v2402_v11 }
 0x621   :  { %v1598_v38 = vrot.slane %v1588_v63, %v2203_v8  ;;  %p2006_p0 = pnand %p2005_p13, %p1999_p10 }
 0x622   :  { %v1486_v2 = vadd.f32 %v1485_v41, %v1484_v36  ;;  %v1511_v21 = vrot.slane %v1510_v42, 4  ;;  %v1494_v44 = vrot.slane %v1493_v43, 4  ;;  %v1519_v12 = vadd.f32 %v1518_v20, %v1507_v39 }
 0x623   :  { %v1592_v36 = vrot.slane %v1747_v29, %v2205_v9  ;;  %v1564_v20 = vrot.slane %v1554_v32, %v2195_v1 }
 0x624   :  { %v1487_v45 = vrot.slane %v1486_v2, 2  ;;  %v1512_v62 = vadd.f32 %v1511_v21, %v1510_v42  ;;  %v1495_v46 = vadd.f32 %v1494_v44, %v1493_v43  ;;  %v1520_v47 = vrot.slane %v1519_v12, 4 }
 0x626   :  { %v1488_v48 = vadd.f32 %v1487_v45, %v1486_v2  ;;  %v1513_v33 = vrot.slane %v1512_v62, 2  ;;  %v1496_v49 = vrot.slane %v1495_v46, 2  ;;  %v1521_v50 = vadd.f32 %v1520_v47, %v1519_v12 }
 0x628   :  { %v1489_v51 = vrot.slane %v1488_v48, 1  ;;  %v1514_v52 = vadd.f32 %v1513_v33, %v1512_v62  ;;  %v1497_v31 = vadd.f32 %v1496_v49, %v1495_v46  ;;  %v1522_v53 = vrot.slane %v1521_v50, 2 }
 0x62a   :  { %v1490_v54 = vadd.f32 %v1489_v51, %v1488_v48  ;;  %v1515_v55 = vrot.slane %v1514_v52, 1  ;;  %v1498_v24 = vrot.slane %v1497_v31, 1  ;;  %v1523_v56 = vadd.f32 %v1522_v53, %v1521_v50 }
 0x62c   :  { %v1516_v57 = vadd.f32 %v1515_v55, %v1514_v52  ;;  %v1526_v58 = vmul.f32 0.03125, %v1490_v54  ;;  %v1499_v59 = vadd.f32 %v1498_v24, %v1497_v31  ;;  %v1524_v0 = vrot.slane %v1523_v56, 1 }
 0x62e   :  { %v1528_v3 = vmul.f32 0.03125, %v1516_v57  ;;  %v1530_v4 = vmul.f32 %v1526_v58, %v1526_v58  ;;  %v1525_v6 = vadd.f32 %v1524_v0, %v1523_v56  ;;  %v1527_v10 = vmul.f32 0.03125, %v1499_v59 }
 0x62f   :  { %v1538_v34 = vsub.f32 %v2367_v18, %v1526_v58  ;;  %v1540_v35 = vsub.f32 %v2371_v23, %v1526_v58  ;;  %v1542_v13 = vsub.f32 %v2379_v60, %v1526_v58  ;;  %v1544_v37 = vsub.f32 %v2396_v40, %v1526_v58 }
 0x630   :  { %v1532_v14 = vsub.f32 %v1528_v3, %v1530_v4  ;;  %v1529_v15 = vmul.f32 0.03125, %v1525_v6  ;;  %v1531_v16 = vmul.f32 %v1527_v10, %v1527_v10  ;;  %v1539_v41 = vsub.f32 %v2369_v22, %v1527_v10 }
 0x631   :  { %v1541_v5 = vsub.f32 %v2373_v26, %v1527_v10  ;;  %v1543_v42 = vsub.f32 %v2389_v61, %v1527_v10  ;;  %v1545_v18 = vsub.f32 %v2402_v11, %v1527_v10  ;;  %v1565_v43 = vmul.f32 %v1560_v7, %v1538_v34 }
 0x632   :  { %v1534_v17 = vmax.f32 %v1532_v14, 0.0  ;;  %v1533_v27 = vsub.f32 %v1529_v15, %v1531_v16  ;;  %v1567_v23 = vmul.f32 %v1560_v7, %v1540_v35  ;;  %v1569_v39 = vmul.f32 %v1560_v7, %v1542_v13 }
 0x633   :  { %v1571_v60 = vmul.f32 %v1560_v7, %v1544_v37  ;;  %v1602_v40 = vrot.slane %v1592_v36, %v2203_v8  ;;  %v1566_v1 = vmul.f32 %v1564_v20, %v1539_v41  ;;  %v1568_v45 = vmul.f32 %v1564_v20, %v1541_v5 }
 0x634   :  { %v1573_v25 = vadd.f32 1e-05, %v1534_v17  ;;  %v1535_v28 = vmax.f32 %v1533_v27, 0.0  ;;  %v1570_v22 = vmul.f32 %v1564_v20, %v1543_v42  ;;  %v1572_v62 = vmul.f32 %v1564_v20, %v1545_v18 }
 0x636   :  { %1954 = vrsqrt.f32 %v1573_v25  ;;  %v1574_v19 = vadd.f32 1e-05, %v1535_v28 }
 0x638   :  { %1956 = vrsqrt.f32 %v1574_v19 }
 0x643   :  { %v1955_v2 = vpop.eup %1954 }
 0x644   :  { %v1577_v9 = vmul.f32 %v1955_v2, %v1565_v43  ;;  %v1579_v21 = vmul.f32 %v1955_v2, %v1567_v23  ;;  %v1581_v44 = vmul.f32 %v1955_v2, %v1569_v39  ;;  %v1583_v12 = vmul.f32 %v1955_v2, %v1571_v60 }
 0x645   :  { %v1957_v26 = vpop.eup %1956 }
 0x646   :  { %v1603_v46 = vadd.f32 %v1598_v38, %v1577_v9  ;;  %v1605_v61 = vadd.f32 %v1598_v38, %v1579_v21  ;;  %v1607_v47 = vadd.f32 %v1598_v38, %v1581_v44  ;;  %v1609_v11 = vadd.f32 %v1598_v38, %v1583_v12 }
 0x647   :  { %v1578_v48 = vmul.f32 %v1957_v26, %v1566_v1  ;;  %v1580_v33 = vmul.f32 %v1957_v26, %v1568_v45  ;;  %v1582_v49 = vmul.f32 %v1957_v26, %v1570_v22  ;;  %v1584_v50 = vmul.f32 %v1957_v26, %v1572_v62 }
 0x648   :  { %v1611_v51 = vmax.f32 %v1603_v46, 0.0  ;;  %v1613_v52 = vmax.f32 %v1605_v61, 0.0  ;;  %v1615_v8 = vmax.f32 %v1607_v47, 0.0  ;;  %v1617_v31 = vmax.f32 %v1609_v11, 0.0 }
 0x649   :  { %v1604_v53 = vadd.f32 %v1602_v40, %v1578_v48  ;;  %v1606_v54 = vadd.f32 %v1602_v40, %v1580_v33  ;;  %v1608_v55 = vadd.f32 %v1602_v40, %v1582_v49  ;;  %v1610_v24 = vadd.f32 %v1602_v40, %v1584_v50 }
 0x64a   :  { %1619 = vst [vmem:[#allocation7] sm:$0xff] %v1611_v51  ;;  %1621 = vst [vmem:[#allocation7 + $0x10] sm:$0xff] %v1613_v52 }
 0x64b   :  { %1623 = vst [vmem:[#allocation7 + $0x20] sm:$0xff] %v1615_v8  ;;  %1625 = vst [vmem:[#allocation7 + $0x30] sm:$0xff] %v1617_v31  ;;  %v1612_v56 = vmax.f32 %v1604_v53, 0.0  ;;  %v1614_v57 = vmax.f32 %v1606_v54, 0.0  ;;  %v1616_v58 = vmax.f32 %v1608_v55, 0.0  ;;  %v1618_v59 = vmax.f32 %v1610_v24, 0.0 }
 0x64d   :  { %1620 = vst [vmem:[#allocation7 + $0x8] sm:$0xff] %v1612_v56  ;;  %1622 = vst [vmem:[#allocation7 + $0x18] sm:$0xff] %v1614_v57 }
 0x64e   :  { %1624 = vst [vmem:[#allocation7 + $0x28] sm:$0xff] %v1616_v58  ;;  %1626 = vst [vmem:[#allocation7 + $0x38] sm:$0xff] %v1618_v59 }
 0x64f   :  { %2009 = shalt.err (!%p2006_p0)
}
 0x650   :  { %s2030_s22 = smov 256   ;;  %s2031_s23 = smov 16  }
 0x651   :  { %1638 = dma.vmem_to_hbm [thread:$0]  %s1633_s21, 1024, %s2437_s8, [#allocation4], %s2030_s22, %s2030_s22, %s2031_s23  }
 0x652   :  { %2022 = dma.done.wait [#allocation4], 1024  }
 0x653   :  { %2023 = vsyncadd [#allocation4], 4294966272 }
 0x654   :  { %1642 = vsyncpa [#allocation3], 1 }
 0x655   :  { %1643 = vsyncpa [#allocation6], 1 }
 0x656   :  { %1644 = vsyncpa [#allocation4], 1 }

</bundles_post_ra>
